<compile_context>
chip_gen: v5e
topology: v5e:2x2
jax: 0.10.0
libtpu: 0.0.40
codegen_flags: <defaults>
</compile_context>

<pallas_src>
import functools

import jax
import jax.numpy as jnp
from jax import lax
from jax.experimental import pallas as pl
from jax.experimental.pallas import tpu as pltpu


def _r(n, m):
    """Round n up to a multiple of m (static Python ints)."""
    return ((n + m - 1) // m) * m


# ----------------------------- Pallas kernel -------------------------------
def audio_extractor_kernel(
    x_ref,    # (T*Bp, C)  bf16 time-major rows: row t*Bp + b == x[b, :, t]
    w_ref,    # (*, LW)    bf16 slab: [Wih1; Whh1; Wih2; Whh2], row-padded to 16
    f_ref,    # (*, LW)    f32  slab: [b1; b2; wemb*gamma; beta@wemb+bemb], row-padded to 8
    out_ref,  # (Bp, LW)   f32 (lanes >= O are zero)
    *, T, Bp, C, H1, H2,
):
    LW = w_ref.shape[1]

    # ---- unpack bf16 weight slab (tile-aligned static slices) ----
    r1 = _r(C, 16)
    r2 = r1 + _r(H1, 16)
    r3 = r2 + _r(H1, 16)
    wih1 = w_ref[0:C, :]            # (C,  LW)
    whh1 = w_ref[r1:r1 + H1, :]     # (H1, LW)
    wih2 = w_ref[r2:r2 + H1, :]     # (H1, LW)
    whh2 = w_ref[r3:r3 + H2, :]     # (H2, LW)

    # ---- f32 slab: biases now, (folded) emb weights in the epilogue ----
    s_b2 = _r(1, 8)
    s_we = s_b2 + _r(1, 8)
    s_be = s_we + _r(H2, 8)
    b1 = f_ref[0:1, :]                                          # (1, LW)
    b2 = jnp.broadcast_to(f_ref[s_b2:s_b2 + 1, :], (Bp, LW))    # hoisted broadcast

    # ---- layer-1 input projection for ALL steps: one bf16 MXU pass, off-chain ----
    x_proj = jnp.dot(x_ref[...], wih1, preferred_element_type=jnp.float32) + b1

    # ---- one-EUP-push LSTM cell: sigmoid(z) = 0.5*tanh(0.5*z)+0.5 ----
    # PyTorch gate order i, f, g, o: pre/post scale 0.5 on i/f/o lanes, 1.0 on g.
    def make_cell(H):
        lane = lax.broadcasted_iota(jnp.int32, (Bp, LW), 1)
        is_g = (lane >= 2 * H) & (lane < 3 * H)
        scale = jnp.where(is_g, 1.0, 0.5).astype(jnp.float32)
        offset = jnp.where(is_g, 0.0, 0.5).astype(jnp.float32)

        def cell(gates, c):
            a = scale * jnp.tanh(gates * scale) + offset   # sigmoid(i,f,o) & tanh(g)
            i = a[:, 0 * H:1 * H]
            f = a[:, 1 * H:2 * H]
            g = a[:, 2 * H:3 * H]
            o = a[:, 3 * H:4 * H]
            c_new = f * c + i * g
            h_new = o * jnp.tanh(c_new)
            return h_new, c_new

        return cell

    cell1 = make_cell(H1)
    cell2 = make_cell(H2)

    h1 = jnp.zeros((Bp, H1), jnp.float32)
    c1 = jnp.zeros((Bp, H1), jnp.float32)
    h2 = jnp.zeros((Bp, H2), jnp.float32)
    c2 = jnp.zeros((Bp, H2), jnp.float32)

    # Static T -> fully unrolled recurrence; layer-1 step t+1 and layer-2 step t
    # are independent so the scheduler can interleave them.
    for t in range(T):
        gates1 = x_proj[t * Bp:(t + 1) * Bp, :] + jnp.dot(
            h1.astype(jnp.bfloat16), whh1, preferred_element_type=jnp.float32)
        h1, c1 = cell1(gates1, c1)

        gates2 = (jnp.dot(h1.astype(jnp.bfloat16), wih2,
                          preferred_element_type=jnp.float32)
                  + jnp.dot(h2.astype(jnp.bfloat16), whh2,
                            preferred_element_type=jnp.float32)
                  + b2)
        h2, c2 = cell2(gates2, c2)

    # ---- LayerNorm on last step (gamma/beta folded into wemb/bemb) + Linear ----
    # One-pass variance is safe here: h2 is tanh-bounded in (-1, 1).
    mu = jnp.mean(h2, axis=-1, keepdims=True)
    ex2 = jnp.mean(h2 * h2, axis=-1, keepdims=True)
    var = ex2 - mu * mu
    xn = (h2 - mu) * lax.rsqrt(var + 1e-5)

    wemb = f_ref[s_we:s_we + H2, :]      # (H2, LW), LN gamma folded, lanes >= O zero
    bemb = f_ref[s_be:s_be + 1, :]       # (1, LW),  LN beta folded
    out_ref[...] = jnp.dot(xn, wemb, preferred_element_type=jnp.float32) + bemb


# ------------------------- one-time parameter packing ------------------------
def pack_params(params):
    """Pack the 8 parameter arrays into 2 contiguous slabs (one bf16, one f32),
    fold LayerNorm gamma/beta into the final Linear, lane-pad everything to a
    common width.  Pure parameter transforms; call once outside the hot path."""
    C = params["wih1"].shape[0]
    H1 = params["whh1"].shape[0]
    H2 = params["whh2"].shape[0]
    O = params["wemb"].shape[1]
    LW = 128 * max(1, pl.cdiv(max(4 * H1, 4 * H2, O), 128))

    def pad(a, rows):
        return jnp.pad(a, ((0, rows - a.shape[0]), (0, LW - a.shape[1])))

    # bf16 matmul-weight slab, each piece row-padded to a multiple of 16 (bf16 tile).
    wslab = jnp.concatenate([
        pad(params["wih1"], _r(C, 16)),
        pad(params["whh1"], _r(H1, 16)),
        pad(params["wih2"], _r(H1, 16)),
        pad(params["whh2"], _r(H2, 16)),
    ], axis=0).astype(jnp.bfloat16)

    # f32 slab: biases + LN-folded emb weights, pieces row-padded to multiples of 8.
    gamma_col = params["gamma"].reshape(-1, 1)                      # (H2, 1)
    beta_row = params["beta"].reshape(1, -1)                        # (1, H2)
    wemb_f = params["wemb"] * gamma_col                             # diag(gamma) @ W
    bemb_f = beta_row @ params["wemb"] + params["bemb"]             # beta @ W + b
    fslab = jnp.concatenate([
        pad(params["b1"], _r(1, 8)),
        pad(params["b2"], _r(1, 8)),
        pad(wemb_f, _r(H2, 8)),
        pad(bemb_f, _r(1, 8)),
    ], axis=0).astype(jnp.float32)

    return dict(wslab=wslab, fslab=fslab, dims=(C, H1, H2, O, LW))


# ------------------------------- wrapper ------------------------------------
@functools.partial(jax.jit, static_argnames=("dims",))
def _forward(x_ncw, wslab, fslab, dims):
    C, H1, H2, O, LW = dims
    B, _, T = x_ncw.shape
    Bp = max(8, _r(B, 8))   # pad batch to a full f32 sublane tile

    # Single fused pad + transpose + reshape + bf16 cast over a ~4 KiB tensor:
    # time-major rows (T*Bp, C) so every per-step slice is a whole (8,128) tile.
    xb = jnp.pad(x_ncw, ((0, Bp - B), (0, 0), (0, 0)))
    x_flat = jnp.transpose(xb, (2, 0, 1)).reshape(T * Bp, C).astype(jnp.bfloat16)

    kernel = functools.partial(
        audio_extractor_kernel, T=T, Bp=Bp, C=C, H1=H1, H2=H2)
    vmem = pl.BlockSpec(memory_space=pltpu.MemorySpace.VMEM)
    out = pl.pallas_call(
        kernel,
        out_shape=jax.ShapeDtypeStruct((Bp, LW), jnp.float32),
        in_specs=[vmem, vmem, vmem],
        out_specs=vmem,
    )(x_flat, wslab, fslab)
    return out[:B, :O]


def audio_extractor(x_ncw, packed):
    """x_ncw: (B, input_size, T) float32 -- same layout the PyTorch module gets."""
    return _forward(x_ncw, packed["wslab"], packed["fslab"], packed["dims"])


# --------------------------- pure-JAX reference ------------------------------
def audio_extractor_ref(x_ncw, params, matmul_dtype=jnp.float32):
    """Reference.  matmul_dtype=jnp.bfloat16 matches the kernel's MXU-operand
    precision (elementwise / LN / final Linear stay f32)."""
    x = jnp.transpose(x_ncw, (0, 2, 1))  # (B, T, C)
    B, T, _ = x.shape
    H1 = params["whh1"].shape[0]
    H2 = params["whh2"].shape[0]

    def mm(a, b):
        return jnp.dot(a.astype(matmul_dtype), b.astype(matmul_dtype),
                       preferred_element_type=jnp.float32)

    def cell(x_t, h, c, wih, whh, b, H):
        g = mm(x_t, wih) + mm(h, whh) + b
        i = jax.nn.sigmoid(g[:, :H])
        f = jax.nn.sigmoid(g[:, H:2 * H])
        gg = jnp.tanh(g[:, 2 * H:3 * H])
        o = jax.nn.sigmoid(g[:, 3 * H:])
        c = f * c + i * gg
        return o * jnp.tanh(c), c

    h1 = jnp.zeros((B, H1)); c1 = jnp.zeros((B, H1))
    h2 = jnp.zeros((B, H2)); c2 = jnp.zeros((B, H2))
    for t in range(T):
        h1, c1 = cell(x[:, t, :], h1, c1, params["wih1"], params["whh1"], params["b1"], H1)
        h2, c2 = cell(h1, h2, c2, params["wih2"], params["whh2"], params["b2"], H2)
    mu = jnp.mean(h2, axis=-1, keepdims=True)
    var = jnp.mean((h2 - mu) ** 2, axis=-1, keepdims=True)
    y = (h2 - mu) * lax.rsqrt(var + 1e-5) * params["gamma"] + params["beta"]
    return y @ params["wemb"] + params["bemb"]


# ------------------------------ param init -----------------------------------
def init_params(key, input_size, hidden_size, output_size):
    H1, H2 = hidden_size, 32
    ks = jax.random.split(key, 12)

    def u(k, shape, fan):
        bound = 1.0 / jnp.sqrt(fan)
        return jax.random.uniform(k, shape, jnp.float32, -bound, bound)

    # PyTorch stores (4H, in); pre-transpose to (in, 4H) for x @ W.
    wih1 = u(ks[0], (4 * H1, input_size), H1).T
    whh1 = u(ks[1], (4 * H1, H1), H1).T
    b1 = (u(ks[2], (4 * H1,), H1) + u(ks[3], (4 * H1,), H1)).reshape(1, 4 * H1)

    wih2 = u(ks[4], (4 * H2, H1), H2).T
    whh2 = u(ks[5], (4 * H2, H2), H2).T
    b2 = (u(ks[6], (4 * H2,), H2) + u(ks[7], (4 * H2,), H2)).reshape(1, 4 * H2)

    # Non-trivial LN affine so the gamma/beta folding is actually exercised.
    gamma = 1.0 + 0.1 * jax.random.normal(ks[10], (1, H2), jnp.float32)
    beta = 0.1 * jax.random.normal(ks[11], (1, H2), jnp.float32)

    wemb = u(ks[8], (output_size, H2), H2).T
    bemb = u(ks[9], (output_size,), H2).reshape(1, output_size)

    return dict(wih1=wih1, whh1=whh1, b1=b1,
                wih2=wih2, whh2=whh2, b2=b2,
                gamma=gamma, beta=beta, wemb=wemb, bemb=bemb)


if __name__ == "__main__":
    # Module config: input_size=16, hidden_size=32, num_layers=1, output_size=8,
    # dropout=0.0 (dropout is a no-op for single-layer LSTMs; `tasks` unused).
    B, INPUT, T, HIDDEN, OUT = 2, 16, 8, 32, 8

    key = jax.random.PRNGKey(0)
    kx, kp = jax.random.split(key)
    x = jax.random.normal(kx, (B, INPUT, T), jnp.float32)  # (B, input_size, T)
    params = init_params(kp, INPUT, HIDDEN, OUT)
    packed = pack_params(params)

    out = jax.block_until_ready(audio_extractor(x, packed))
    assert out.shape == (B, OUT)

    # Tight check against a reference with matched MXU-operand precision (bf16
    # matmuls, f32 everywhere else): verifies the kernel structure (gate order,
    # hoisted projection, LN/emb folding, batch padding) exactly.
    ref_bf16 = audio_extractor_ref(x, params, matmul_dtype=jnp.bfloat16)
    assert jnp.allclose(out, ref_bf16, atol=2e-3, rtol=2e-3), "mismatch vs bf16-matched reference"

    # Loose sanity check against full-f32 math: the only difference is the
    # intentional bf16 MXU-operand cast (expected drift ~1e-3..1e-2).
    ref_f32 = audio_extractor_ref(x, params, matmul_dtype=jnp.float32)
    assert jnp.allclose(out, ref_f32, atol=5e-2, rtol=5e-2), "mismatch vs f32 reference"

    print("KERNEL_OK")
</pallas_src>

<mosaic_0001>
module attributes {stable_mosaic.version = 11 : i64} {
  func.func @audio_extractor_kernel(%arg0: memref<64x16xbf16, #tpu.memory_space<vmem>>, %arg1: memref<112x128xbf16, #tpu.memory_space<vmem>>, %arg2: memref<56x128xf32, #tpu.memory_space<vmem>>, %arg3: memref<8x128xf32, #tpu.memory_space<vmem>>) attributes {dimension_semantics = [], scalar_prefetch = 0 : i64, scratch_operands = 0 : i64, tpu.core_type = #tpu.core_type<tc>} {
    %c0 = arith.constant 0 : index
    %c0_0 = arith.constant 0 : index
    %0 = vector.load %arg1[%c0, %c0_0] : memref<112x128xbf16, #tpu.memory_space<vmem>>, vector<16x128xbf16>
    %c16 = arith.constant 16 : index
    %c0_1 = arith.constant 0 : index
    %1 = vector.load %arg1[%c16, %c0_1] : memref<112x128xbf16, #tpu.memory_space<vmem>>, vector<32x128xbf16>
    %c48 = arith.constant 48 : index
    %c0_2 = arith.constant 0 : index
    %2 = vector.load %arg1[%c48, %c0_2] : memref<112x128xbf16, #tpu.memory_space<vmem>>, vector<32x128xbf16>
    %c80 = arith.constant 80 : index
    %c0_3 = arith.constant 0 : index
    %3 = vector.load %arg1[%c80, %c0_3] : memref<112x128xbf16, #tpu.memory_space<vmem>>, vector<32x128xbf16>
    %c0_4 = arith.constant 0 : index
    %c0_5 = arith.constant 0 : index
    %4 = vector.load %arg2[%c0_4, %c0_5] : memref<56x128xf32, #tpu.memory_space<vmem>>, vector<1x128xf32>
    %c8 = arith.constant 8 : index
    %c0_6 = arith.constant 0 : index
    %5 = vector.load %arg2[%c8, %c0_6] : memref<56x128xf32, #tpu.memory_space<vmem>>, vector<1x128xf32>
    %6 = vector.shape_cast %5 : vector<1x128xf32> to vector<1x128xf32>
    %7 = vector.broadcast %6 : vector<1x128xf32> to vector<8x128xf32>
    %c0_7 = arith.constant 0 : index
    %c0_8 = arith.constant 0 : index
    %8 = vector.load %arg0[%c0_7, %c0_8] : memref<64x16xbf16, #tpu.memory_space<vmem>>, vector<64x16xbf16>
    %cst = arith.constant dense<0.000000e+00> : vector<64x128xf32>
    %9 = tpu.matmul %8, %0, %cst {dimension_numbers = #tpu.dot_dimension_numbers<[1], [0], [0], [1], [0, 0, 1, 1], [], []>} : vector<64x16xbf16>, vector<16x128xbf16>, vector<64x128xf32> -> vector<64x128xf32>
    %10 = vector.broadcast %4 : vector<1x128xf32> to vector<64x128xf32>
    %11 = arith.addf %9, %10 : vector<64x128xf32>
    %12 = tpu.iota {dimensions = array<i32: 1>} : vector<8x128xi32>
    %c64_i32 = arith.constant 64 : i32
    %13 = vector.broadcast %c64_i32 : i32 to vector<8x128xi32>
    %14 = arith.cmpi sge, %12, %13 : vector<8x128xi32>
    %c96_i32 = arith.constant 96 : i32
    %15 = vector.broadcast %c96_i32 : i32 to vector<8x128xi32>
    %16 = arith.cmpi slt, %12, %15 : vector<8x128xi32>
    %17 = arith.andi %14, %16 : vector<8x128xi1>
    %cst_9 = arith.constant 1.000000e+00 : f32
    %cst_10 = arith.constant 5.000000e-01 : f32
    %18 = vector.broadcast %cst_9 : f32 to vector<8x128xf32>
    %19 = vector.broadcast %cst_10 : f32 to vector<8x128xf32>
    %20 = arith.select %17, %18, %19 : vector<8x128xi1>, vector<8x128xf32>
    %cst_11 = arith.constant 0.000000e+00 : f32
    %cst_12 = arith.constant 5.000000e-01 : f32
    %21 = vector.broadcast %cst_11 : f32 to vector<8x128xf32>
    %22 = vector.broadcast %cst_12 : f32 to vector<8x128xf32>
    %23 = arith.select %17, %21, %22 : vector<8x128xi1>, vector<8x128xf32>
    %24 = tpu.iota {dimensions = array<i32: 1>} : vector<8x128xi32>
    %c64_i32_13 = arith.constant 64 : i32
    %25 = vector.broadcast %c64_i32_13 : i32 to vector<8x128xi32>
    %26 = arith.cmpi sge, %24, %25 : vector<8x128xi32>
    %c96_i32_14 = arith.constant 96 : i32
    %27 = vector.broadcast %c96_i32_14 : i32 to vector<8x128xi32>
    %28 = arith.cmpi slt, %24, %27 : vector<8x128xi32>
    %29 = arith.andi %26, %28 : vector<8x128xi1>
    %cst_15 = arith.constant 1.000000e+00 : f32
    %cst_16 = arith.constant 5.000000e-01 : f32
    %30 = vector.broadcast %cst_15 : f32 to vector<8x128xf32>
    %31 = vector.broadcast %cst_16 : f32 to vector<8x128xf32>
    %32 = arith.select %29, %30, %31 : vector<8x128xi1>, vector<8x128xf32>
    %cst_17 = arith.constant 0.000000e+00 : f32
    %cst_18 = arith.constant 5.000000e-01 : f32
    %33 = vector.broadcast %cst_17 : f32 to vector<8x128xf32>
    %34 = vector.broadcast %cst_18 : f32 to vector<8x128xf32>
    %35 = arith.select %29, %33, %34 : vector<8x128xi1>, vector<8x128xf32>
    %cst_19 = arith.constant 0.000000e+00 : f32
    %36 = vector.broadcast %cst_19 : f32 to vector<8x32xf32>
    %cst_20 = arith.constant 0.000000e+00 : f32
    %37 = vector.broadcast %cst_20 : f32 to vector<8x32xf32>
    %cst_21 = arith.constant 0.000000e+00 : f32
    %38 = vector.broadcast %cst_21 : f32 to vector<8x32xf32>
    %cst_22 = arith.constant 0.000000e+00 : f32
    %39 = vector.broadcast %cst_22 : f32 to vector<8x32xf32>
    %40 = vector.extract_strided_slice %11 {offsets = [0, 0], sizes = [8, 128], strides = [1, 1]} : vector<64x128xf32> to vector<8x128xf32>
    %41 = arith.truncf %36 : vector<8x32xf32> to vector<8x32xbf16>
    %cst_23 = arith.constant dense<0.000000e+00> : vector<8x128xf32>
    %42 = tpu.matmul %41, %1, %cst_23 {dimension_numbers = #tpu.dot_dimension_numbers<[1], [0], [0], [1], [0, 0, 1, 1], [], []>} : vector<8x32xbf16>, vector<32x128xbf16>, vector<8x128xf32> -> vector<8x128xf32>
    %43 = arith.addf %40, %42 : vector<8x128xf32>
    %44 = arith.mulf %43, %20 : vector<8x128xf32>
    %45 = math.tanh %44 : vector<8x128xf32>
    %46 = arith.mulf %20, %45 : vector<8x128xf32>
    %47 = arith.addf %46, %23 : vector<8x128xf32>
    %48 = vector.extract_strided_slice %47 {offsets = [0, 0], sizes = [8, 32], strides = [1, 1]} : vector<8x128xf32> to vector<8x32xf32>
    %49 = vector.extract_strided_slice %47 {offsets = [0, 32], sizes = [8, 32], strides = [1, 1]} : vector<8x128xf32> to vector<8x32xf32>
    %50 = vector.extract_strided_slice %47 {offsets = [0, 64], sizes = [8, 32], strides = [1, 1]} : vector<8x128xf32> to vector<8x32xf32>
    %51 = vector.extract_strided_slice %47 {offsets = [0, 96], sizes = [8, 32], strides = [1, 1]} : vector<8x128xf32> to vector<8x32xf32>
    %52 = arith.mulf %49, %37 : vector<8x32xf32>
    %53 = arith.mulf %48, %50 : vector<8x32xf32>
    %54 = arith.addf %52, %53 : vector<8x32xf32>
    %55 = math.tanh %54 : vector<8x32xf32>
    %56 = arith.mulf %51, %55 : vector<8x32xf32>
    %57 = arith.truncf %56 : vector<8x32xf32> to vector<8x32xbf16>
    %cst_24 = arith.constant dense<0.000000e+00> : vector<8x128xf32>
    %58 = tpu.matmul %57, %2, %cst_24 {dimension_numbers = #tpu.dot_dimension_numbers<[1], [0], [0], [1], [0, 0, 1, 1], [], []>} : vector<8x32xbf16>, vector<32x128xbf16>, vector<8x128xf32> -> vector<8x128xf32>
    %59 = arith.truncf %38 : vector<8x32xf32> to vector<8x32xbf16>
    %cst_25 = arith.constant dense<0.000000e+00> : vector<8x128xf32>
    %60 = tpu.matmul %59, %3, %cst_25 {dimension_numbers = #tpu.dot_dimension_numbers<[1], [0], [0], [1], [0, 0, 1, 1], [], []>} : vector<8x32xbf16>, vector<32x128xbf16>, vector<8x128xf32> -> vector<8x128xf32>
    %61 = arith.addf %58, %60 : vector<8x128xf32>
    %62 = arith.addf %61, %7 : vector<8x128xf32>
    %63 = arith.mulf %62, %32 : vector<8x128xf32>
    %64 = math.tanh %63 : vector<8x128xf32>
    %65 = arith.mulf %32, %64 : vector<8x128xf32>
    %66 = arith.addf %65, %35 : vector<8x128xf32>
    %67 = vector.extract_strided_slice %66 {offsets = [0, 0], sizes = [8, 32], strides = [1, 1]} : vector<8x128xf32> to vector<8x32xf32>
    %68 = vector.extract_strided_slice %66 {offsets = [0, 32], sizes = [8, 32], strides = [1, 1]} : vector<8x128xf32> to vector<8x32xf32>
    %69 = vector.extract_strided_slice %66 {offsets = [0, 64], sizes = [8, 32], strides = [1, 1]} : vector<8x128xf32> to vector<8x32xf32>
    %70 = vector.extract_strided_slice %66 {offsets = [0, 96], sizes = [8, 32], strides = [1, 1]} : vector<8x128xf32> to vector<8x32xf32>
    %71 = arith.mulf %68, %39 : vector<8x32xf32>
    %72 = arith.mulf %67, %69 : vector<8x32xf32>
    %73 = arith.addf %71, %72 : vector<8x32xf32>
    %74 = math.tanh %73 : vector<8x32xf32>
    %75 = arith.mulf %70, %74 : vector<8x32xf32>
    %76 = vector.extract_strided_slice %11 {offsets = [8, 0], sizes = [8, 128], strides = [1, 1]} : vector<64x128xf32> to vector<8x128xf32>
    %77 = arith.truncf %56 : vector<8x32xf32> to vector<8x32xbf16>
    %cst_26 = arith.constant dense<0.000000e+00> : vector<8x128xf32>
    %78 = tpu.matmul %77, %1, %cst_26 {dimension_numbers = #tpu.dot_dimension_numbers<[1], [0], [0], [1], [0, 0, 1, 1], [], []>} : vector<8x32xbf16>, vector<32x128xbf16>, vector<8x128xf32> -> vector<8x128xf32>
    %79 = arith.addf %76, %78 : vector<8x128xf32>
    %80 = arith.mulf %79, %20 : vector<8x128xf32>
    %81 = math.tanh %80 : vector<8x128xf32>
    %82 = arith.mulf %20, %81 : vector<8x128xf32>
    %83 = arith.addf %82, %23 : vector<8x128xf32>
    %84 = vector.extract_strided_slice %83 {offsets = [0, 0], sizes = [8, 32], strides = [1, 1]} : vector<8x128xf32> to vector<8x32xf32>
    %85 = vector.extract_strided_slice %83 {offsets = [0, 32], sizes = [8, 32], strides = [1, 1]} : vector<8x128xf32> to vector<8x32xf32>
    %86 = vector.extract_strided_slice %83 {offsets = [0, 64], sizes = [8, 32], strides = [1, 1]} : vector<8x128xf32> to vector<8x32xf32>
    %87 = vector.extract_strided_slice %83 {offsets = [0, 96], sizes = [8, 32], strides = [1, 1]} : vector<8x128xf32> to vector<8x32xf32>
    %88 = arith.mulf %85, %54 : vector<8x32xf32>
    %89 = arith.mulf %84, %86 : vector<8x32xf32>
    %90 = arith.addf %88, %89 : vector<8x32xf32>
    %91 = math.tanh %90 : vector<8x32xf32>
    %92 = arith.mulf %87, %91 : vector<8x32xf32>
    %93 = arith.truncf %92 : vector<8x32xf32> to vector<8x32xbf16>
    %cst_27 = arith.constant dense<0.000000e+00> : vector<8x128xf32>
    %94 = tpu.matmul %93, %2, %cst_27 {dimension_numbers = #tpu.dot_dimension_numbers<[1], [0], [0], [1], [0, 0, 1, 1], [], []>} : vector<8x32xbf16>, vector<32x128xbf16>, vector<8x128xf32> -> vector<8x128xf32>
    %95 = arith.truncf %75 : vector<8x32xf32> to vector<8x32xbf16>
    %cst_28 = arith.constant dense<0.000000e+00> : vector<8x128xf32>
    %96 = tpu.matmul %95, %3, %cst_28 {dimension_numbers = #tpu.dot_dimension_numbers<[1], [0], [0], [1], [0, 0, 1, 1], [], []>} : vector<8x32xbf16>, vector<32x128xbf16>, vector<8x128xf32> -> vector<8x128xf32>
    %97 = arith.addf %94, %96 : vector<8x128xf32>
    %98 = arith.addf %97, %7 : vector<8x128xf32>
    %99 = arith.mulf %98, %32 : vector<8x128xf32>
    %100 = math.tanh %99 : vector<8x128xf32>
    %101 = arith.mulf %32, %100 : vector<8x128xf32>
    %102 = arith.addf %101, %35 : vector<8x128xf32>
    %103 = vector.extract_strided_slice %102 {offsets = [0, 0], sizes = [8, 32], strides = [1, 1]} : vector<8x128xf32> to vector<8x32xf32>
    %104 = vector.extract_strided_slice %102 {offsets = [0, 32], sizes = [8, 32], strides = [1, 1]} : vector<8x128xf32> to vector<8x32xf32>
    %105 = vector.extract_strided_slice %102 {offsets = [0, 64], sizes = [8, 32], strides = [1, 1]} : vector<8x128xf32> to vector<8x32xf32>
    %106 = vector.extract_strided_slice %102 {offsets = [0, 96], sizes = [8, 32], strides = [1, 1]} : vector<8x128xf32> to vector<8x32xf32>
    %107 = arith.mulf %104, %73 : vector<8x32xf32>
    %108 = arith.mulf %103, %105 : vector<8x32xf32>
    %109 = arith.addf %107, %108 : vector<8x32xf32>
    %110 = math.tanh %109 : vector<8x32xf32>
    %111 = arith.mulf %106, %110 : vector<8x32xf32>
    %112 = vector.extract_strided_slice %11 {offsets = [16, 0], sizes = [8, 128], strides = [1, 1]} : vector<64x128xf32> to vector<8x128xf32>
    %113 = arith.truncf %92 : vector<8x32xf32> to vector<8x32xbf16>
    %cst_29 = arith.constant dense<0.000000e+00> : vector<8x128xf32>
    %114 = tpu.matmul %113, %1, %cst_29 {dimension_numbers = #tpu.dot_dimension_numbers<[1], [0], [0], [1], [0, 0, 1, 1], [], []>} : vector<8x32xbf16>, vector<32x128xbf16>, vector<8x128xf32> -> vector<8x128xf32>
    %115 = arith.addf %112, %114 : vector<8x128xf32>
    %116 = arith.mulf %115, %20 : vector<8x128xf32>
    %117 = math.tanh %116 : vector<8x128xf32>
    %118 = arith.mulf %20, %117 : vector<8x128xf32>
    %119 = arith.addf %118, %23 : vector<8x128xf32>
    %120 = vector.extract_strided_slice %119 {offsets = [0, 0], sizes = [8, 32], strides = [1, 1]} : vector<8x128xf32> to vector<8x32xf32>
    %121 = vector.extract_strided_slice %119 {offsets = [0, 32], sizes = [8, 32], strides = [1, 1]} : vector<8x128xf32> to vector<8x32xf32>
    %122 = vector.extract_strided_slice %119 {offsets = [0, 64], sizes = [8, 32], strides = [1, 1]} : vector<8x128xf32> to vector<8x32xf32>
    %123 = vector.extract_strided_slice %119 {offsets = [0, 96], sizes = [8, 32], strides = [1, 1]} : vector<8x128xf32> to vector<8x32xf32>
    %124 = arith.mulf %121, %90 : vector<8x32xf32>
    %125 = arith.mulf %120, %122 : vector<8x32xf32>
    %126 = arith.addf %124, %125 : vector<8x32xf32>
    %127 = math.tanh %126 : vector<8x32xf32>
    %128 = arith.mulf %123, %127 : vector<8x32xf32>
    %129 = arith.truncf %128 : vector<8x32xf32> to vector<8x32xbf16>
    %cst_30 = arith.constant dense<0.000000e+00> : vector<8x128xf32>
    %130 = tpu.matmul %129, %2, %cst_30 {dimension_numbers = #tpu.dot_dimension_numbers<[1], [0], [0], [1], [0, 0, 1, 1], [], []>} : vector<8x32xbf16>, vector<32x128xbf16>, vector<8x128xf32> -> vector<8x128xf32>
    %131 = arith.truncf %111 : vector<8x32xf32> to vector<8x32xbf16>
    %cst_31 = arith.constant dense<0.000000e+00> : vector<8x128xf32>
    %132 = tpu.matmul %131, %3, %cst_31 {dimension_numbers = #tpu.dot_dimension_numbers<[1], [0], [0], [1], [0, 0, 1, 1], [], []>} : vector<8x32xbf16>, vector<32x128xbf16>, vector<8x128xf32> -> vector<8x128xf32>
    %133 = arith.addf %130, %132 : vector<8x128xf32>
    %134 = arith.addf %133, %7 : vector<8x128xf32>
    %135 = arith.mulf %134, %32 : vector<8x128xf32>
    %136 = math.tanh %135 : vector<8x128xf32>
    %137 = arith.mulf %32, %136 : vector<8x128xf32>
    %138 = arith.addf %137, %35 : vector<8x128xf32>
    %139 = vector.extract_strided_slice %138 {offsets = [0, 0], sizes = [8, 32], strides = [1, 1]} : vector<8x128xf32> to vector<8x32xf32>
    %140 = vector.extract_strided_slice %138 {offsets = [0, 32], sizes = [8, 32], strides = [1, 1]} : vector<8x128xf32> to vector<8x32xf32>
    %141 = vector.extract_strided_slice %138 {offsets = [0, 64], sizes = [8, 32], strides = [1, 1]} : vector<8x128xf32> to vector<8x32xf32>
    %142 = vector.extract_strided_slice %138 {offsets = [0, 96], sizes = [8, 32], strides = [1, 1]} : vector<8x128xf32> to vector<8x32xf32>
    %143 = arith.mulf %140, %109 : vector<8x32xf32>
    %144 = arith.mulf %139, %141 : vector<8x32xf32>
    %145 = arith.addf %143, %144 : vector<8x32xf32>
    %146 = math.tanh %145 : vector<8x32xf32>
    %147 = arith.mulf %142, %146 : vector<8x32xf32>
    %148 = vector.extract_strided_slice %11 {offsets = [24, 0], sizes = [8, 128], strides = [1, 1]} : vector<64x128xf32> to vector<8x128xf32>
    %149 = arith.truncf %128 : vector<8x32xf32> to vector<8x32xbf16>
    %cst_32 = arith.constant dense<0.000000e+00> : vector<8x128xf32>
    %150 = tpu.matmul %149, %1, %cst_32 {dimension_numbers = #tpu.dot_dimension_numbers<[1], [0], [0], [1], [0, 0, 1, 1], [], []>} : vector<8x32xbf16>, vector<32x128xbf16>, vector<8x128xf32> -> vector<8x128xf32>
    %151 = arith.addf %148, %150 : vector<8x128xf32>
    %152 = arith.mulf %151, %20 : vector<8x128xf32>
    %153 = math.tanh %152 : vector<8x128xf32>
    %154 = arith.mulf %20, %153 : vector<8x128xf32>
    %155 = arith.addf %154, %23 : vector<8x128xf32>
    %156 = vector.extract_strided_slice %155 {offsets = [0, 0], sizes = [8, 32], strides = [1, 1]} : vector<8x128xf32> to vector<8x32xf32>
    %157 = vector.extract_strided_slice %155 {offsets = [0, 32], sizes = [8, 32], strides = [1, 1]} : vector<8x128xf32> to vector<8x32xf32>
    %158 = vector.extract_strided_slice %155 {offsets = [0, 64], sizes = [8, 32], strides = [1, 1]} : vector<8x128xf32> to vector<8x32xf32>
    %159 = vector.extract_strided_slice %155 {offsets = [0, 96], sizes = [8, 32], strides = [1, 1]} : vector<8x128xf32> to vector<8x32xf32>
    %160 = arith.mulf %157, %126 : vector<8x32xf32>
    %161 = arith.mulf %156, %158 : vector<8x32xf32>
    %162 = arith.addf %160, %161 : vector<8x32xf32>
    %163 = math.tanh %162 : vector<8x32xf32>
    %164 = arith.mulf %159, %163 : vector<8x32xf32>
    %165 = arith.truncf %164 : vector<8x32xf32> to vector<8x32xbf16>
    %cst_33 = arith.constant dense<0.000000e+00> : vector<8x128xf32>
    %166 = tpu.matmul %165, %2, %cst_33 {dimension_numbers = #tpu.dot_dimension_numbers<[1], [0], [0], [1], [0, 0, 1, 1], [], []>} : vector<8x32xbf16>, vector<32x128xbf16>, vector<8x128xf32> -> vector<8x128xf32>
    %167 = arith.truncf %147 : vector<8x32xf32> to vector<8x32xbf16>
    %cst_34 = arith.constant dense<0.000000e+00> : vector<8x128xf32>
    %168 = tpu.matmul %167, %3, %cst_34 {dimension_numbers = #tpu.dot_dimension_numbers<[1], [0], [0], [1], [0, 0, 1, 1], [], []>} : vector<8x32xbf16>, vector<32x128xbf16>, vector<8x128xf32> -> vector<8x128xf32>
    %169 = arith.addf %166, %168 : vector<8x128xf32>
    %170 = arith.addf %169, %7 : vector<8x128xf32>
    %171 = arith.mulf %170, %32 : vector<8x128xf32>
    %172 = math.tanh %171 : vector<8x128xf32>
    %173 = arith.mulf %32, %172 : vector<8x128xf32>
    %174 = arith.addf %173, %35 : vector<8x128xf32>
    %175 = vector.extract_strided_slice %174 {offsets = [0, 0], sizes = [8, 32], strides = [1, 1]} : vector<8x128xf32> to vector<8x32xf32>
    %176 = vector.extract_strided_slice %174 {offsets = [0, 32], sizes = [8, 32], strides = [1, 1]} : vector<8x128xf32> to vector<8x32xf32>
    %177 = vector.extract_strided_slice %174 {offsets = [0, 64], sizes = [8, 32], strides = [1, 1]} : vector<8x128xf32> to vector<8x32xf32>
    %178 = vector.extract_strided_slice %174 {offsets = [0, 96], sizes = [8, 32], strides = [1, 1]} : vector<8x128xf32> to vector<8x32xf32>
    %179 = arith.mulf %176, %145 : vector<8x32xf32>
    %180 = arith.mulf %175, %177 : vector<8x32xf32>
    %181 = arith.addf %179, %180 : vector<8x32xf32>
    %182 = math.tanh %181 : vector<8x32xf32>
    %183 = arith.mulf %178, %182 : vector<8x32xf32>
    %184 = vector.extract_strided_slice %11 {offsets = [32, 0], sizes = [8, 128], strides = [1, 1]} : vector<64x128xf32> to vector<8x128xf32>
    %185 = arith.truncf %164 : vector<8x32xf32> to vector<8x32xbf16>
    %cst_35 = arith.constant dense<0.000000e+00> : vector<8x128xf32>
    %186 = tpu.matmul %185, %1, %cst_35 {dimension_numbers = #tpu.dot_dimension_numbers<[1], [0], [0], [1], [0, 0, 1, 1], [], []>} : vector<8x32xbf16>, vector<32x128xbf16>, vector<8x128xf32> -> vector<8x128xf32>
    %187 = arith.addf %184, %186 : vector<8x128xf32>
    %188 = arith.mulf %187, %20 : vector<8x128xf32>
    %189 = math.tanh %188 : vector<8x128xf32>
    %190 = arith.mulf %20, %189 : vector<8x128xf32>
    %191 = arith.addf %190, %23 : vector<8x128xf32>
    %192 = vector.extract_strided_slice %191 {offsets = [0, 0], sizes = [8, 32], strides = [1, 1]} : vector<8x128xf32> to vector<8x32xf32>
    %193 = vector.extract_strided_slice %191 {offsets = [0, 32], sizes = [8, 32], strides = [1, 1]} : vector<8x128xf32> to vector<8x32xf32>
    %194 = vector.extract_strided_slice %191 {offsets = [0, 64], sizes = [8, 32], strides = [1, 1]} : vector<8x128xf32> to vector<8x32xf32>
    %195 = vector.extract_strided_slice %191 {offsets = [0, 96], sizes = [8, 32], strides = [1, 1]} : vector<8x128xf32> to vector<8x32xf32>
    %196 = arith.mulf %193, %162 : vector<8x32xf32>
    %197 = arith.mulf %192, %194 : vector<8x32xf32>
    %198 = arith.addf %196, %197 : vector<8x32xf32>
    %199 = math.tanh %198 : vector<8x32xf32>
    %200 = arith.mulf %195, %199 : vector<8x32xf32>
    %201 = arith.truncf %200 : vector<8x32xf32> to vector<8x32xbf16>
    %cst_36 = arith.constant dense<0.000000e+00> : vector<8x128xf32>
    %202 = tpu.matmul %201, %2, %cst_36 {dimension_numbers = #tpu.dot_dimension_numbers<[1], [0], [0], [1], [0, 0, 1, 1], [], []>} : vector<8x32xbf16>, vector<32x128xbf16>, vector<8x128xf32> -> vector<8x128xf32>
    %203 = arith.truncf %183 : vector<8x32xf32> to vector<8x32xbf16>
    %cst_37 = arith.constant dense<0.000000e+00> : vector<8x128xf32>
    %204 = tpu.matmul %203, %3, %cst_37 {dimension_numbers = #tpu.dot_dimension_numbers<[1], [0], [0], [1], [0, 0, 1, 1], [], []>} : vector<8x32xbf16>, vector<32x128xbf16>, vector<8x128xf32> -> vector<8x128xf32>
    %205 = arith.addf %202, %204 : vector<8x128xf32>
    %206 = arith.addf %205, %7 : vector<8x128xf32>
    %207 = arith.mulf %206, %32 : vector<8x128xf32>
    %208 = math.tanh %207 : vector<8x128xf32>
    %209 = arith.mulf %32, %208 : vector<8x128xf32>
    %210 = arith.addf %209, %35 : vector<8x128xf32>
    %211 = vector.extract_strided_slice %210 {offsets = [0, 0], sizes = [8, 32], strides = [1, 1]} : vector<8x128xf32> to vector<8x32xf32>
    %212 = vector.extract_strided_slice %210 {offsets = [0, 32], sizes = [8, 32], strides = [1, 1]} : vector<8x128xf32> to vector<8x32xf32>
    %213 = vector.extract_strided_slice %210 {offsets = [0, 64], sizes = [8, 32], strides = [1, 1]} : vector<8x128xf32> to vector<8x32xf32>
    %214 = vector.extract_strided_slice %210 {offsets = [0, 96], sizes = [8, 32], strides = [1, 1]} : vector<8x128xf32> to vector<8x32xf32>
    %215 = arith.mulf %212, %181 : vector<8x32xf32>
    %216 = arith.mulf %211, %213 : vector<8x32xf32>
    %217 = arith.addf %215, %216 : vector<8x32xf32>
    %218 = math.tanh %217 : vector<8x32xf32>
    %219 = arith.mulf %214, %218 : vector<8x32xf32>
    %220 = vector.extract_strided_slice %11 {offsets = [40, 0], sizes = [8, 128], strides = [1, 1]} : vector<64x128xf32> to vector<8x128xf32>
    %221 = arith.truncf %200 : vector<8x32xf32> to vector<8x32xbf16>
    %cst_38 = arith.constant dense<0.000000e+00> : vector<8x128xf32>
    %222 = tpu.matmul %221, %1, %cst_38 {dimension_numbers = #tpu.dot_dimension_numbers<[1], [0], [0], [1], [0, 0, 1, 1], [], []>} : vector<8x32xbf16>, vector<32x128xbf16>, vector<8x128xf32> -> vector<8x128xf32>
    %223 = arith.addf %220, %222 : vector<8x128xf32>
    %224 = arith.mulf %223, %20 : vector<8x128xf32>
    %225 = math.tanh %224 : vector<8x128xf32>
    %226 = arith.mulf %20, %225 : vector<8x128xf32>
    %227 = arith.addf %226, %23 : vector<8x128xf32>
    %228 = vector.extract_strided_slice %227 {offsets = [0, 0], sizes = [8, 32], strides = [1, 1]} : vector<8x128xf32> to vector<8x32xf32>
    %229 = vector.extract_strided_slice %227 {offsets = [0, 32], sizes = [8, 32], strides = [1, 1]} : vector<8x128xf32> to vector<8x32xf32>
    %230 = vector.extract_strided_slice %227 {offsets = [0, 64], sizes = [8, 32], strides = [1, 1]} : vector<8x128xf32> to vector<8x32xf32>
    %231 = vector.extract_strided_slice %227 {offsets = [0, 96], sizes = [8, 32], strides = [1, 1]} : vector<8x128xf32> to vector<8x32xf32>
    %232 = arith.mulf %229, %198 : vector<8x32xf32>
    %233 = arith.mulf %228, %230 : vector<8x32xf32>
    %234 = arith.addf %232, %233 : vector<8x32xf32>
    %235 = math.tanh %234 : vector<8x32xf32>
    %236 = arith.mulf %231, %235 : vector<8x32xf32>
    %237 = arith.truncf %236 : vector<8x32xf32> to vector<8x32xbf16>
    %cst_39 = arith.constant dense<0.000000e+00> : vector<8x128xf32>
    %238 = tpu.matmul %237, %2, %cst_39 {dimension_numbers = #tpu.dot_dimension_numbers<[1], [0], [0], [1], [0, 0, 1, 1], [], []>} : vector<8x32xbf16>, vector<32x128xbf16>, vector<8x128xf32> -> vector<8x128xf32>
    %239 = arith.truncf %219 : vector<8x32xf32> to vector<8x32xbf16>
    %cst_40 = arith.constant dense<0.000000e+00> : vector<8x128xf32>
    %240 = tpu.matmul %239, %3, %cst_40 {dimension_numbers = #tpu.dot_dimension_numbers<[1], [0], [0], [1], [0, 0, 1, 1], [], []>} : vector<8x32xbf16>, vector<32x128xbf16>, vector<8x128xf32> -> vector<8x128xf32>
    %241 = arith.addf %238, %240 : vector<8x128xf32>
    %242 = arith.addf %241, %7 : vector<8x128xf32>
    %243 = arith.mulf %242, %32 : vector<8x128xf32>
    %244 = math.tanh %243 : vector<8x128xf32>
    %245 = arith.mulf %32, %244 : vector<8x128xf32>
    %246 = arith.addf %245, %35 : vector<8x128xf32>
    %247 = vector.extract_strided_slice %246 {offsets = [0, 0], sizes = [8, 32], strides = [1, 1]} : vector<8x128xf32> to vector<8x32xf32>
    %248 = vector.extract_strided_slice %246 {offsets = [0, 32], sizes = [8, 32], strides = [1, 1]} : vector<8x128xf32> to vector<8x32xf32>
    %249 = vector.extract_strided_slice %246 {offsets = [0, 64], sizes = [8, 32], strides = [1, 1]} : vector<8x128xf32> to vector<8x32xf32>
    %250 = vector.extract_strided_slice %246 {offsets = [0, 96], sizes = [8, 32], strides = [1, 1]} : vector<8x128xf32> to vector<8x32xf32>
    %251 = arith.mulf %248, %217 : vector<8x32xf32>
    %252 = arith.mulf %247, %249 : vector<8x32xf32>
    %253 = arith.addf %251, %252 : vector<8x32xf32>
    %254 = math.tanh %253 : vector<8x32xf32>
    %255 = arith.mulf %250, %254 : vector<8x32xf32>
    %256 = vector.extract_strided_slice %11 {offsets = [48, 0], sizes = [8, 128], strides = [1, 1]} : vector<64x128xf32> to vector<8x128xf32>
    %257 = arith.truncf %236 : vector<8x32xf32> to vector<8x32xbf16>
    %cst_41 = arith.constant dense<0.000000e+00> : vector<8x128xf32>
    %258 = tpu.matmul %257, %1, %cst_41 {dimension_numbers = #tpu.dot_dimension_numbers<[1], [0], [0], [1], [0, 0, 1, 1], [], []>} : vector<8x32xbf16>, vector<32x128xbf16>, vector<8x128xf32> -> vector<8x128xf32>
    %259 = arith.addf %256, %258 : vector<8x128xf32>
    %260 = arith.mulf %259, %20 : vector<8x128xf32>
    %261 = math.tanh %260 : vector<8x128xf32>
    %262 = arith.mulf %20, %261 : vector<8x128xf32>
    %263 = arith.addf %262, %23 : vector<8x128xf32>
    %264 = vector.extract_strided_slice %263 {offsets = [0, 0], sizes = [8, 32], strides = [1, 1]} : vector<8x128xf32> to vector<8x32xf32>
    %265 = vector.extract_strided_slice %263 {offsets = [0, 32], sizes = [8, 32], strides = [1, 1]} : vector<8x128xf32> to vector<8x32xf32>
    %266 = vector.extract_strided_slice %263 {offsets = [0, 64], sizes = [8, 32], strides = [1, 1]} : vector<8x128xf32> to vector<8x32xf32>
    %267 = vector.extract_strided_slice %263 {offsets = [0, 96], sizes = [8, 32], strides = [1, 1]} : vector<8x128xf32> to vector<8x32xf32>
    %268 = arith.mulf %265, %234 : vector<8x32xf32>
    %269 = arith.mulf %264, %266 : vector<8x32xf32>
    %270 = arith.addf %268, %269 : vector<8x32xf32>
    %271 = math.tanh %270 : vector<8x32xf32>
    %272 = arith.mulf %267, %271 : vector<8x32xf32>
    %273 = arith.truncf %272 : vector<8x32xf32> to vector<8x32xbf16>
    %cst_42 = arith.constant dense<0.000000e+00> : vector<8x128xf32>
    %274 = tpu.matmul %273, %2, %cst_42 {dimension_numbers = #tpu.dot_dimension_numbers<[1], [0], [0], [1], [0, 0, 1, 1], [], []>} : vector<8x32xbf16>, vector<32x128xbf16>, vector<8x128xf32> -> vector<8x128xf32>
    %275 = arith.truncf %255 : vector<8x32xf32> to vector<8x32xbf16>
    %cst_43 = arith.constant dense<0.000000e+00> : vector<8x128xf32>
    %276 = tpu.matmul %275, %3, %cst_43 {dimension_numbers = #tpu.dot_dimension_numbers<[1], [0], [0], [1], [0, 0, 1, 1], [], []>} : vector<8x32xbf16>, vector<32x128xbf16>, vector<8x128xf32> -> vector<8x128xf32>
    %277 = arith.addf %274, %276 : vector<8x128xf32>
    %278 = arith.addf %277, %7 : vector<8x128xf32>
    %279 = arith.mulf %278, %32 : vector<8x128xf32>
    %280 = math.tanh %279 : vector<8x128xf32>
    %281 = arith.mulf %32, %280 : vector<8x128xf32>
    %282 = arith.addf %281, %35 : vector<8x128xf32>
    %283 = vector.extract_strided_slice %282 {offsets = [0, 0], sizes = [8, 32], strides = [1, 1]} : vector<8x128xf32> to vector<8x32xf32>
    %284 = vector.extract_strided_slice %282 {offsets = [0, 32], sizes = [8, 32], strides = [1, 1]} : vector<8x128xf32> to vector<8x32xf32>
    %285 = vector.extract_strided_slice %282 {offsets = [0, 64], sizes = [8, 32], strides = [1, 1]} : vector<8x128xf32> to vector<8x32xf32>
    %286 = vector.extract_strided_slice %282 {offsets = [0, 96], sizes = [8, 32], strides = [1, 1]} : vector<8x128xf32> to vector<8x32xf32>
    %287 = arith.mulf %284, %253 : vector<8x32xf32>
    %288 = arith.mulf %283, %285 : vector<8x32xf32>
    %289 = arith.addf %287, %288 : vector<8x32xf32>
    %290 = math.tanh %289 : vector<8x32xf32>
    %291 = arith.mulf %286, %290 : vector<8x32xf32>
    %292 = vector.extract_strided_slice %11 {offsets = [56, 0], sizes = [8, 128], strides = [1, 1]} : vector<64x128xf32> to vector<8x128xf32>
    %293 = arith.truncf %272 : vector<8x32xf32> to vector<8x32xbf16>
    %cst_44 = arith.constant dense<0.000000e+00> : vector<8x128xf32>
    %294 = tpu.matmul %293, %1, %cst_44 {dimension_numbers = #tpu.dot_dimension_numbers<[1], [0], [0], [1], [0, 0, 1, 1], [], []>} : vector<8x32xbf16>, vector<32x128xbf16>, vector<8x128xf32> -> vector<8x128xf32>
    %295 = arith.addf %292, %294 : vector<8x128xf32>
    %296 = arith.mulf %295, %20 : vector<8x128xf32>
    %297 = math.tanh %296 : vector<8x128xf32>
    %298 = arith.mulf %20, %297 : vector<8x128xf32>
    %299 = arith.addf %298, %23 : vector<8x128xf32>
    %300 = vector.extract_strided_slice %299 {offsets = [0, 0], sizes = [8, 32], strides = [1, 1]} : vector<8x128xf32> to vector<8x32xf32>
    %301 = vector.extract_strided_slice %299 {offsets = [0, 32], sizes = [8, 32], strides = [1, 1]} : vector<8x128xf32> to vector<8x32xf32>
    %302 = vector.extract_strided_slice %299 {offsets = [0, 64], sizes = [8, 32], strides = [1, 1]} : vector<8x128xf32> to vector<8x32xf32>
    %303 = vector.extract_strided_slice %299 {offsets = [0, 96], sizes = [8, 32], strides = [1, 1]} : vector<8x128xf32> to vector<8x32xf32>
    %304 = arith.mulf %301, %270 : vector<8x32xf32>
    %305 = arith.mulf %300, %302 : vector<8x32xf32>
    %306 = arith.addf %304, %305 : vector<8x32xf32>
    %307 = math.tanh %306 : vector<8x32xf32>
    %308 = arith.mulf %303, %307 : vector<8x32xf32>
    %309 = arith.truncf %308 : vector<8x32xf32> to vector<8x32xbf16>
    %cst_45 = arith.constant dense<0.000000e+00> : vector<8x128xf32>
    %310 = tpu.matmul %309, %2, %cst_45 {dimension_numbers = #tpu.dot_dimension_numbers<[1], [0], [0], [1], [0, 0, 1, 1], [], []>} : vector<8x32xbf16>, vector<32x128xbf16>, vector<8x128xf32> -> vector<8x128xf32>
    %311 = arith.truncf %291 : vector<8x32xf32> to vector<8x32xbf16>
    %cst_46 = arith.constant dense<0.000000e+00> : vector<8x128xf32>
    %312 = tpu.matmul %311, %3, %cst_46 {dimension_numbers = #tpu.dot_dimension_numbers<[1], [0], [0], [1], [0, 0, 1, 1], [], []>} : vector<8x32xbf16>, vector<32x128xbf16>, vector<8x128xf32> -> vector<8x128xf32>
    %313 = arith.addf %310, %312 : vector<8x128xf32>
    %314 = arith.addf %313, %7 : vector<8x128xf32>
    %315 = arith.mulf %314, %32 : vector<8x128xf32>
    %316 = math.tanh %315 : vector<8x128xf32>
    %317 = arith.mulf %32, %316 : vector<8x128xf32>
    %318 = arith.addf %317, %35 : vector<8x128xf32>
    %319 = vector.extract_strided_slice %318 {offsets = [0, 0], sizes = [8, 32], strides = [1, 1]} : vector<8x128xf32> to vector<8x32xf32>
    %320 = vector.extract_strided_slice %318 {offsets = [0, 32], sizes = [8, 32], strides = [1, 1]} : vector<8x128xf32> to vector<8x32xf32>
    %321 = vector.extract_strided_slice %318 {offsets = [0, 64], sizes = [8, 32], strides = [1, 1]} : vector<8x128xf32> to vector<8x32xf32>
    %322 = vector.extract_strided_slice %318 {offsets = [0, 96], sizes = [8, 32], strides = [1, 1]} : vector<8x128xf32> to vector<8x32xf32>
    %323 = arith.mulf %320, %289 : vector<8x32xf32>
    %324 = arith.mulf %319, %321 : vector<8x32xf32>
    %325 = arith.addf %323, %324 : vector<8x32xf32>
    %326 = math.tanh %325 : vector<8x32xf32>
    %327 = arith.mulf %322, %326 : vector<8x32xf32>
    %cst_47 = arith.constant dense<0.000000e+00> : vector<8xf32>
    %328 = vector.multi_reduction <add>, %327, %cst_47 [1] : vector<8x32xf32> to vector<8xf32>
    %329 = vector.shape_cast %328 : vector<8xf32> to vector<8x1xf32>
    %cst_48 = arith.constant 3.200000e+01 : f32
    %330 = vector.broadcast %cst_48 : f32 to vector<8x1xf32>
    %331 = arith.divf %329, %330 : vector<8x1xf32>
    %332 = arith.mulf %327, %327 : vector<8x32xf32>
    %cst_49 = arith.constant dense<0.000000e+00> : vector<8xf32>
    %333 = vector.multi_reduction <add>, %332, %cst_49 [1] : vector<8x32xf32> to vector<8xf32>
    %334 = vector.shape_cast %333 : vector<8xf32> to vector<8x1xf32>
    %cst_50 = arith.constant 3.200000e+01 : f32
    %335 = vector.broadcast %cst_50 : f32 to vector<8x1xf32>
    %336 = arith.divf %334, %335 : vector<8x1xf32>
    %337 = arith.mulf %331, %331 : vector<8x1xf32>
    %338 = arith.subf %336, %337 : vector<8x1xf32>
    %339 = vector.broadcast %331 : vector<8x1xf32> to vector<8x32xf32>
    %340 = arith.subf %327, %339 : vector<8x32xf32>
    %cst_51 = arith.constant 9.99999974E-6 : f32
    %341 = vector.broadcast %cst_51 : f32 to vector<8x1xf32>
    %342 = arith.addf %338, %341 : vector<8x1xf32>
    %343 = math.rsqrt %342 : vector<8x1xf32>
    %344 = vector.broadcast %343 : vector<8x1xf32> to vector<8x32xf32>
    %345 = arith.mulf %340, %344 : vector<8x32xf32>
    %c16_52 = arith.constant 16 : index
    %c0_53 = arith.constant 0 : index
    %346 = vector.load %arg2[%c16_52, %c0_53] : memref<56x128xf32, #tpu.memory_space<vmem>>, vector<32x128xf32>
    %c48_54 = arith.constant 48 : index
    %c0_55 = arith.constant 0 : index
    %347 = vector.load %arg2[%c48_54, %c0_55] : memref<56x128xf32, #tpu.memory_space<vmem>>, vector<1x128xf32>
    %cst_56 = arith.constant dense<0.000000e+00> : vector<8x128xf32>
    %348 = tpu.matmul %345, %346, %cst_56 {dimension_numbers = #tpu.dot_dimension_numbers<[1], [0], [0], [1], [0, 0, 1, 1], [], []>} : vector<8x32xf32>, vector<32x128xf32>, vector<8x128xf32> -> vector<8x128xf32>
    %349 = vector.broadcast %347 : vector<1x128xf32> to vector<8x128xf32>
    %350 = arith.addf %348, %349 : vector<8x128xf32>
    %c0_57 = arith.constant 0 : index
    %c0_58 = arith.constant 0 : index
    %351 = vector.load %arg3[%c0_57, %c0_58] : memref<8x128xf32, #tpu.memory_space<vmem>>, vector<8x128xf32>
    tpu.vector_store %arg3[%c0_57, %c0_58], %350 {strides = array<i32>} : memref<8x128xf32, #tpu.memory_space<vmem>>, vector<8x128xf32>,
    return
  }
}

</mosaic_0001>

<bundles_post_ra>
// kernel: _forward.1
= control target key start
LH: loop header
LB: loop body
LE: loop exit
PB: predicated region body
PF: predicated region fallthrough
CT: control target
= control target key end

     0   :  { %vm67_vm0 = vcmask 130048   ;;  %v1158_v4 = vmov 0   ;;  %v109_v5 = vlaneseq  ;;  %v1159_v10 = vmov 0.5   ;;  %s1160_s22 = smov 64   ;;  %s1161_s23 = smov 32   ;;  %s1488_s1 = inlined_call_operand.vmem [shape: bf16[112,128], index: 1, kind: input, shape index: {}]   ;;  %s1489_s0 = inlined_call_operand.vmem [shape: bf16[64,16], index: 0, kind: input, shape index: {}]   ;;  %s1490_s2 = inlined_call_operand.vmem [shape: f32[56,128], index: 2, kind: input, shape index: {}]   ;;  %s1491_s3 = inlined_call_operand.vmem [shape: f32[8,128], index: 3, kind: output, shape index: {}]  }
   0x1   :  { %v1071_v0 = vld [vmem:[%s1488_s1] sm:$0xff]  ;;  %v1189_v1 = vld [vmem:[%s1488_s1 + $0x10] sm:$0xff]  ;;  %v1198_v3 = vld [vmem:[%s1488_s1 + $0x8] sm:$0xff]  ;;  %vm128_vm4 = vcmask 261120  }
   0x2   :  { %v1078_v2 = vld [vmem:[%s1489_s0] sm:$0xff]  ;;  %87 = vmatpush.bf16.msra.mxu0 %v1071_v0  ;;  %138 = vmatpush.bf16.msra.mxu1 %v1189_v1  ;;  %v110_v6 = vand.u32 127, %v109_v5  ;;  %v1230_v26 = vld [vmem:[%s1488_s1 + $0x30] sm:$0xff]  ;;  %v1241_v28 = vld [vmem:[%s1488_s1 + $0x28] sm:$0xff] }
   0x3   :  { %v1211_v7 = vld [vmem:[%s1490_s2] ss:$0 sm:$0xff]  ;;  %186 = vmatpush.bf16.msra.mxu2 %v1230_v26  ;;  %v1247_v29 = vld [vmem:[%s1488_s1 + $0x18] sm:$0xff]  ;;  %v1269_v38 = vld [vmem:[%s1490_s2 + $0x8] ss:$0 sm:$0xff] }
   0x4   :  { %vm111_vm1 = vcmp.ge.s32.totalorder %v110_v6, 64  ;;  %vm112_vm2 = vcmp.lt.s32.totalorder %v110_v6, 96  ;;  %v1235_v27 = vld [vmem:[%s1488_s1 + $0x20] sm:$0xff] }
   0x5   :  { %1020 = vmatmul.msk.bf16.vlgmr.msra.gmra.mxu0 %vm67_vm0, %v1078_v2  ;;  %vm113_vm3 = vmand %vm111_vm1, %vm112_vm2  ;;  %217 = vmatpush.bf16.msra.mxu3 %v1235_v27 }
   0x6   :  { %543 = vmatpush.bf16.msrb.mxu0 %v1189_v1  ;;  %139 = vmatpush.bf16.msra.mxu1 %v1198_v3  ;;  %v1214_v11 = vsel %vm113_vm3, 1.0, %v1159_v10  ;;  %v1217_v17 = vsel %vm113_vm3, 0.0, %v1159_v10 }
   0x7   :  { %187 = vmatpush.bf16.msra.mxu2 %v1241_v28 }
   0x9   :  { %140 = vmatmul.bf16.vlgmr.msra.gmra.mxu1 %v1158_v4  ;;  %218 = vmatpush.bf16.msra.mxu3 %v1247_v29 }
   0xa   :  { %252 = vmatpush.bf16.msrb.mxu1 %v1189_v1  ;;  %544 = vmatpush.bf16.msrb.mxu0 %v1198_v3 }
   0xb   :  { %295 = vmatpush.bf16.msrb.mxu2 %v1230_v26 }
   0xc   :  { %188 = vmatmul.bf16.vlgmr.msra.gmra.mxu2 %v1158_v4 }
   0xd   :  { %314 = vmatpush.bf16.msrb.mxu3 %v1235_v27 }
   0xe   :  { %253 = vmatpush.bf16.msrb.mxu1 %v1198_v3  ;;  %683 = vmatpush.bf16.msra.mxu0 %v1230_v26 }
   0xf   :  { %296 = vmatpush.bf16.msrb.mxu2 %v1241_v28 }
  0x11   :  { %315 = vmatpush.bf16.msrb.mxu3 %v1247_v29 }
  0x12   :  { %349 = vmatpush.bf16.msra.mxu1 %v1189_v1  ;;  %684 = vmatpush.bf16.msra.mxu0 %v1241_v28 }
  0x13   :  { %392 = vmatpush.bf16.msra.mxu2 %v1230_v26 }
  0x16   :  { %350 = vmatpush.bf16.msra.mxu1 %v1198_v3 }
  0x17   :  { %393 = vmatpush.bf16.msra.mxu2 %v1241_v28 }
  0x82   :  { %v89_v8 = vpop.f32.mrf.mxu0 }
  0x83   :  { %v90_v9 = vadd.f32 %v1211_v7, %v89_v8  ;;  %v1079_v8 = vld [vmem:[%s1489_s0 + $0x8] sm:$0xff] }
  0x84   :  { %1021 = vmatmul.msk.bf16.gmra.mxu0 %vm67_vm0, %v1079_v8 }
  0x86   :  { %v141_v12 = vpop.f32.mrf.mxu1 }
  0x87   :  { %v145_v13 = vadd.f32 %v141_v12, %v90_v9 }
  0x89   :  { %v146_v14 = vmul.f32 %v145_v13, %v1214_v11 }
  0x8a   :  { %v91_v37 = vpop.f32.mrf.mxu0 }
  0x8b   :  { %1090 = vtanh.f32 %v146_v14  ;;  %v92_v40 = vadd.f32 %v1211_v7, %v91_v37 }
  0x8e   :  { %v143_v15 = vpop.f32.mrf.mxu1 }
  0x8f   :  { %v189_v33 = vpop.f32.mrf.mxu2 }
  0x91   :  { %v1091_v16 = vpop.eup %1090 }
  0x92   :  { %v148_v18 = vmul.f32 %v1091_v16, %v1214_v11 }
  0x94   :  { %v149_v19 = vadd.f32 %v148_v18, %v1217_v17 }
  0x96   :  { %152 = vrot.lane.b32.xlu0 %v149_v19, %s1160_s22  ;;  %v150_v22 = vmul.f32 0.0, %v149_v19 }
  0x97   :  { %v191_v35 = vpop.f32.mrf.mxu2 }
 0x101   :  { %v94_v15 = vpop.f32.mrf.mxu0 }
 0x102   :  { %v95_v16 = vadd.f32 %v1211_v7, %v94_v15 }
 0x108   :  { %v153_v20 = vpop.permute.xlu0 %152 }
 0x109   :  { %v155_v21 = vmul.f32 %v153_v20, %v149_v19 }
 0x10b   :  { %157 = vrot.lane.b32.xlu0 %v155_v21, %s1161_s23 }
 0x17d   :  { %v158_v23 = vpop.permute.xlu0 %157 }
 0x17e   :  { %v1223_v24 = vadd.f32 %v158_v23, %v150_v22 }
 0x180   :  { %1092 = vtanh.f32 %v1223_v24 }
 0x186   :  { %v1093_v25 = vpop.eup %1092 }
 0x187   :  { %163 = vrot.lane.b32.xlu1 %v1093_v25, %s1160_s22 }
 0x1f9   :  { %v164_v30 = vpop.permute.xlu1 %163 }
 0x1fa   :  { %v166_v31 = vmul.f32 %v164_v30, %v149_v19 }
 0x1fc   :  { %v167_v32 = vpack.c.bf16 %v166_v31, %v166_v31 }
 0x1fe   :  { %194 = vrot.lane.b32.xlu1 %v167_v32, %s1161_s23 }
 0x270   :  { %v195_v34 = vpop.permute.xlu1 %194 }
 0x271   :  { %1048 = vmatmul.msk.bf16.vlgmr.msra.gmra.mxu3 %vm128_vm4, %v195_v34  ;;  %1049 = vmatmul.msk.bf16.vlgmr.msrb.gmra.mxu1 %vm128_vm4, %v195_v34 }
 0x272   :  { %446 = vmatpush.bf16.msrb.mxu1 %v1189_v1  ;;  %411 = vmatpush.bf16.msra.mxu3 %v1235_v27 }
 0x276   :  { %447 = vmatpush.bf16.msrb.mxu1 %v1198_v3  ;;  %412 = vmatpush.bf16.msra.mxu3 %v1247_v29 }
 0x2ee   :  { %v255_v36 = vpop.f32.mrf.mxu1 }
 0x2ef   :  { %v259_v43 = vadd.f32 %v255_v36, %v92_v40 }
 0x2f1   :  { %v260_v46 = vmul.f32 %v259_v43, %v1214_v11 }
 0x2f4   :  { %v220_v39 = vpop.f32.mrf.mxu3 }
 0x2f5   :  { %v221_v41 = vadd.f32 %v220_v39, %v189_v33 }
 0x2f6   :  { %v257_v42 = vpop.f32.mrf.mxu1 }
 0x2f7   :  { %v224_v44 = vadd.f32 %v1269_v38, %v221_v41 }
 0x2f9   :  { %v225_v45 = vmul.f32 %v224_v44, %v1214_v11 }
 0x2fb   :  { %1094 = vtanh.f32 %v225_v45 }
 0x2fc   :  { %v222_v47 = vpop.f32.mrf.mxu3  ;;  %1096 = vtanh.f32 %v260_v46 }
 0x301   :  { %v1095_v48 = vpop.eup %1094 }
 0x302   :  { %v227_v49 = vmul.f32 %v1095_v48, %v1214_v11  ;;  %v1097_v51 = vpop.eup %1096 }
 0x303   :  { %v262_v52 = vmul.f32 %v1097_v51, %v1214_v11 }
 0x304   :  { %v228_v50 = vadd.f32 %v227_v49, %v1217_v17 }
 0x305   :  { %v263_v53 = vadd.f32 %v262_v52, %v1217_v17 }
 0x306   :  { %231 = vrot.lane.b32.xlu2 %v228_v50, %s1160_s22  ;;  %v229_v58 = vmul.f32 0.0, %v228_v50 }
 0x307   :  { %v264_v61 = vmul.f32 %v263_v53, %v1223_v24 }
 0x30e   :  { %266 = vrot.lane.b32.xlu2 %v263_v53, %s1160_s22 }
 0x360   :  { %v232_v54 = vpop.permute.xlu2 %231 }
 0x361   :  { %v234_v55 = vmul.f32 %v232_v54, %v228_v50 }
 0x363   :  { %236 = vrot.lane.b32.xlu0 %v234_v55, %s1161_s23 }
 0x368   :  { %v267_v56 = vpop.permute.xlu2 %266 }
 0x369   :  { %v269_v57 = vmul.f32 %v267_v56, %v263_v53 }
 0x36b   :  { %271 = vrot.lane.b32.xlu1 %v269_v57, %s1161_s23 }
 0x3d5   :  { %v237_v59 = vpop.permute.xlu0 %236 }
 0x3d6   :  { %v239_v60 = vadd.f32 %v237_v59, %v229_v58 }
 0x3d8   :  { %1098 = vtanh.f32 %v239_v60 }
 0x3dd   :  { %v272_v62 = vpop.permute.xlu1 %271 }
 0x3de   :  { %v1099_v63 = vpop.eup %1098  ;;  %v274_v0 = vadd.f32 %v272_v62, %v264_v61 }
 0x3df   :  { %242 = vrot.lane.b32.xlu2 %v1099_v63, %s1160_s22 }
 0x3e0   :  { %1100 = vtanh.f32 %v274_v0 }
 0x3e6   :  { %v1101_v2 = vpop.eup %1100 }
 0x3e7   :  { %277 = vrot.lane.b32.xlu0 %v1101_v2, %s1160_s22 }
 0x439   :  { %v243_v4 = vpop.permute.xlu2 %242 }
 0x43a   :  { %v245_v5 = vmul.f32 %v243_v4, %v228_v50 }
 0x43c   :  { %v282_v6 = vpack.c.bf16 %v245_v5, %v245_v5 }
 0x43e   :  { %284 = vrot.lane.b32.xlu1 %v282_v6, %s1161_s23 }
 0x459   :  { %v278_v9 = vpop.permute.xlu0 %277 }
 0x45a   :  { %v280_v10 = vmul.f32 %v278_v9, %v263_v53 }
 0x45c   :  { %v281_v12 = vpack.c.bf16 %v280_v10, %v280_v10 }
 0x45e   :  { %303 = vrot.lane.b32.xlu2 %v281_v12, %s1161_s23 }
 0x4b0   :  { %v285_v13 = vpop.permute.xlu1 %284 }
 0x4b1   :  { %1050 = vmatmul.msk.bf16.vlgmr.msrb.gmra.mxu2 %vm128_vm4, %v285_v13 }
 0x4b2   :  { %489 = vmatpush.bf16.msrb.mxu2 %v1230_v26 }
 0x4b6   :  { %490 = vmatpush.bf16.msrb.mxu2 %v1241_v28 }
 0x4b8   :  { %v304_v14 = vpop.permute.xlu2 %303 }
 0x4b9   :  { %1051 = vmatmul.msk.bf16.vlgmr.msrb.gmra.mxu3 %vm128_vm4, %v304_v14  ;;  %1052 = vmatmul.msk.bf16.vlgmr.msra.gmra.mxu1 %vm128_vm4, %v304_v14 }
 0x4ba   :  { %508 = vmatpush.bf16.msrb.mxu3 %v1235_v27  ;;  %586 = vmatpush.bf16.msra.mxu1 %v1230_v26 }
 0x4be   :  { %509 = vmatpush.bf16.msrb.mxu3 %v1247_v29  ;;  %587 = vmatpush.bf16.msra.mxu1 %v1241_v28 }
 0x534   :  { %v298_v18 = vpop.f32.mrf.mxu2 }
 0x536   :  { %v352_v19 = vpop.f32.mrf.mxu1 }
 0x537   :  { %v356_v20 = vadd.f32 %v352_v19, %v95_v16 }
 0x539   :  { %v357_v21 = vmul.f32 %v356_v20, %v1214_v11 }
 0x53b   :  { %1102 = vtanh.f32 %v357_v21 }
 0x53c   :  { %v300_v22 = vpop.f32.mrf.mxu2  ;;  %v317_v23 = vpop.f32.mrf.mxu3 }
 0x53d   :  { %v318_v24 = vadd.f32 %v317_v23, %v298_v18 }
 0x53e   :  { %v354_v25 = vpop.f32.mrf.mxu1 }
 0x53f   :  { %v321_v30 = vadd.f32 %v1269_v38, %v318_v24 }
 0x541   :  { %v1103_v31 = vpop.eup %1102  ;;  %v322_v32 = vmul.f32 %v321_v30, %v1214_v11 }
 0x542   :  { %v359_v33 = vmul.f32 %v1103_v31, %v1214_v11 }
 0x543   :  { %1104 = vtanh.f32 %v322_v32 }
 0x544   :  { %v319_v34 = vpop.f32.mrf.mxu3  ;;  %v360_v35 = vadd.f32 %v359_v33, %v1217_v17 }
 0x546   :  { %363 = vrot.lane.b32.xlu1 %v360_v35, %s1160_s22  ;;  %v361_v48 = vmul.f32 %v360_v35, %v274_v0 }
 0x549   :  { %v1105_v36 = vpop.eup %1104 }
 0x54a   :  { %v324_v37 = vmul.f32 %v1105_v36, %v1214_v11  ;;  %v1080_v36 = vld [vmem:[%s1489_s0 + $0x10] sm:$0xff] }
 0x54b   :  { %1022 = vmatmul.msk.bf16.gmra.mxu0 %vm67_vm0, %v1080_v36 }
 0x54c   :  { %v325_v39 = vadd.f32 %v324_v37, %v1217_v17 }
 0x54e   :  { %328 = vrot.lane.b32.xlu0 %v325_v39, %s1160_s22  ;;  %v326_v44 = vmul.f32 %v325_v39, %v239_v60  ;;  %v96_v60 = vpop.f32.mrf.mxu0 }
 0x54f   :  { %v97_v61 = vadd.f32 %v1211_v7, %v96_v60 }
 0x5b8   :  { %v364_v40 = vpop.permute.xlu1 %363 }
 0x5b9   :  { %v366_v41 = vmul.f32 %v364_v40, %v360_v35 }
 0x5bb   :  { %368 = vrot.lane.b32.xlu0 %v366_v41, %s1161_s23  ;;  %v1081_v41 = vld [vmem:[%s1489_s0 + $0x18] sm:$0xff] }
 0x5bc   :  { %1023 = vmatmul.msk.bf16.gmra.mxu0 %vm67_vm0, %v1081_v41 }
 0x5c0   :  { %v329_v42 = vpop.permute.xlu0 %328 }
 0x5c1   :  { %v331_v43 = vmul.f32 %v329_v42, %v325_v39 }
 0x5c3   :  { %333 = vrot.lane.b32.xlu2 %v331_v43, %s1161_s23 }
 0x61d   :  { %v334_v45 = vpop.permute.xlu2 %333 }
 0x61e   :  { %v1313_v46 = vadd.f32 %v334_v45, %v326_v44 }
 0x620   :  { %1106 = vtanh.f32 %v1313_v46 }
 0x626   :  { %v1107_v47 = vpop.eup %1106 }
 0x627   :  { %339 = vrot.lane.b32.xlu1 %v1107_v47, %s1160_s22  ;;  %v99_v47 = vpop.f32.mrf.mxu0 }
 0x62d   :  { %v369_v49 = vpop.permute.xlu0 %368 }
 0x62e   :  { %v371_v50 = vadd.f32 %v369_v49, %v361_v48 }
 0x62f   :  { %v1366_v48 = vpop.f32.mrf.mxu0 }
 0x630   :  { %1108 = vtanh.f32 %v371_v50 }
 0x636   :  { %v1109_v51 = vpop.eup %1108 }
 0x637   :  { %374 = vrot.lane.b32.xlu2 %v1109_v51, %s1160_s22 }
 0x639   :  { %v1368_v49 = vpop.f32.mrf.mxu0 }
 0x691   :  { %v375_v52 = vpop.permute.xlu2 %374 }
 0x692   :  { %v377_v53 = vmul.f32 %v375_v52, %v360_v35  ;;  %v100_v52 = vadd.f32 %v1211_v7, %v99_v47 }
 0x694   :  { %v378_v54 = vpack.c.bf16 %v377_v53, %v377_v53 }
 0x696   :  { %400 = vrot.lane.b32.xlu1 %v378_v54, %s1161_s23 }
 0x699   :  { %v340_v55 = vpop.permute.xlu1 %339 }
 0x69a   :  { %v342_v56 = vmul.f32 %v340_v55, %v325_v39 }
 0x69c   :  { %v379_v57 = vpack.c.bf16 %v342_v56, %v342_v56 }
 0x69e   :  { %381 = vrot.lane.b32.xlu0 %v379_v57, %s1161_s23 }
 0x708   :  { %v401_v58 = vpop.permute.xlu1 %400 }
 0x709   :  { %1054 = vmatmul.msk.bf16.vlgmr.msra.gmra.mxu3 %vm128_vm4, %v401_v58  ;;  %1055 = vmatmul.msk.bf16.vlgmr.msrb.gmra.mxu1 %vm128_vm4, %v401_v58 }
 0x70a   :  { %640 = vmatpush.bf16.msra.mxu3 %v1189_v1  ;;  %702 = vmatpush.bf16.msrb.mxu1 %v1235_v27 }
 0x70e   :  { %641 = vmatpush.bf16.msra.mxu3 %v1198_v3  ;;  %703 = vmatpush.bf16.msrb.mxu1 %v1247_v29 }
 0x710   :  { %v382_v59 = vpop.permute.xlu0 %381 }
 0x711   :  { %1053 = vmatmul.msk.bf16.vlgmr.msra.gmra.mxu2 %vm128_vm4, %v382_v59 }
 0x712   :  { %605 = vmatpush.bf16.msra.mxu2 %v1235_v27 }
 0x716   :  { %606 = vmatpush.bf16.msra.mxu2 %v1247_v29 }
 0x786   :  { %v449_v62 = vpop.f32.mrf.mxu1 }
 0x787   :  { %v453_v63 = vadd.f32 %v449_v62, %v97_v61 }
 0x789   :  { %v454_v0 = vmul.f32 %v453_v63, %v1214_v11 }
 0x78b   :  { %1110 = vtanh.f32 %v454_v0 }
 0x78c   :  { %v414_v2 = vpop.f32.mrf.mxu3 }
 0x78e   :  { %v451_v4 = vpop.f32.mrf.mxu1 }
 0x791   :  { %v1111_v5 = vpop.eup %1110 }
 0x792   :  { %v456_v6 = vmul.f32 %v1111_v5, %v1214_v11 }
 0x794   :  { %v395_v8 = vpop.f32.mrf.mxu2  ;;  %v416_v9 = vpop.f32.mrf.mxu3  ;;  %v457_v10 = vadd.f32 %v456_v6, %v1217_v17 }
 0x795   :  { %v415_v12 = vadd.f32 %v414_v2, %v395_v8 }
 0x796   :  { %460 = vrot.lane.b32.xlu0 %v457_v10, %s1160_s22  ;;  %v458_v24 = vmul.f32 %v457_v10, %v371_v50  ;;  %v1370_v50 = vpop.f32.mrf.mxu0 }
 0x797   :  { %v418_v13 = vadd.f32 %v1269_v38, %v415_v12 }
 0x799   :  { %v419_v14 = vmul.f32 %v418_v13, %v1214_v11 }
 0x79b   :  { %1112 = vtanh.f32 %v419_v14 }
 0x79c   :  { %v397_v15 = vpop.f32.mrf.mxu2 }
 0x7a1   :  { %v1113_v16 = vpop.eup %1112 }
 0x7a2   :  { %v421_v18 = vmul.f32 %v1113_v16, %v1214_v11 }
 0x7a4   :  { %v422_v19 = vadd.f32 %v421_v18, %v1217_v17 }
 0x7a6   :  { %425 = vrot.lane.b32.xlu2 %v422_v19, %s1160_s22  ;;  %v423_v32 = vmul.f32 %v422_v19, %v1313_v46 }
 0x800   :  { %v426_v20 = vpop.permute.xlu2 %425 }
 0x801   :  { %v428_v21 = vmul.f32 %v426_v20, %v422_v19 }
 0x803   :  { %430 = vrot.lane.b32.xlu1 %v428_v21, %s1161_s23 }
 0x808   :  { %v461_v22 = vpop.permute.xlu0 %460 }
 0x809   :  { %v463_v23 = vmul.f32 %v461_v22, %v457_v10 }
 0x80b   :  { %465 = vrot.lane.b32.xlu2 %v463_v23, %s1161_s23 }
 0x865   :  { %v466_v25 = vpop.permute.xlu2 %465 }
 0x866   :  { %v1341_v30 = vadd.f32 %v466_v25, %v458_v24 }
 0x868   :  { %1114 = vtanh.f32 %v1341_v30 }
 0x86e   :  { %v1115_v31 = vpop.eup %1114 }
 0x86f   :  { %471 = vrot.lane.b32.xlu1 %v1115_v31, %s1160_s22 }
 0x875   :  { %v431_v33 = vpop.permute.xlu1 %430 }
 0x876   :  { %v433_v34 = vadd.f32 %v431_v33, %v423_v32 }
 0x878   :  { %1116 = vtanh.f32 %v433_v34 }
 0x87e   :  { %v1117_v35 = vpop.eup %1116 }
 0x87f   :  { %436 = vrot.lane.b32.xlu0 %v1117_v35, %s1160_s22 }
 0x8e1   :  { %v472_v37 = vpop.permute.xlu1 %471 }
 0x8e2   :  { %v474_v39 = vmul.f32 %v472_v37, %v457_v10 }
 0x8e4   :  { %v475_v40 = vpack.c.bf16 %v474_v39, %v474_v39 }
 0x8e6   :  { %497 = vrot.lane.b32.xlu0 %v475_v40, %s1161_s23 }
 0x8f1   :  { %v437_v42 = vpop.permute.xlu0 %436 }
 0x8f2   :  { %v439_v43 = vmul.f32 %v437_v42, %v422_v19 }
 0x8f4   :  { %v476_v44 = vpack.c.bf16 %v439_v43, %v439_v43 }
 0x8f6   :  { %478 = vrot.lane.b32.xlu2 %v476_v44, %s1161_s23 }
 0x950   :  { %v479_v45 = vpop.permute.xlu2 %478 }
 0x951   :  { %1056 = vmatmul.msk.bf16.vlgmr.msrb.gmra.mxu2 %vm128_vm4, %v479_v45 }
 0x952   :  { %737 = vmatpush.bf16.msrb.mxu2 %v1189_v1 }
 0x956   :  { %738 = vmatpush.bf16.msrb.mxu2 %v1198_v3 }
 0x958   :  { %v498_v46 = vpop.permute.xlu0 %497 }
 0x959   :  { %1057 = vmatmul.msk.bf16.vlgmr.msrb.gmra.mxu3 %vm128_vm4, %v498_v46  ;;  %1058 = vmatmul.msk.bf16.vlgmr.msrb.gmra.mxu0 %vm128_vm4, %v498_v46 }
 0x95a   :  { %780 = vmatpush.bf16.msrb.mxu3 %v1230_v26  ;;  %799 = vmatpush.bf16.msrb.mxu0 %v1235_v27 }
 0x95e   :  { %781 = vmatpush.bf16.msrb.mxu3 %v1241_v28  ;;  %800 = vmatpush.bf16.msrb.mxu0 %v1247_v29 }
 0x9d4   :  { %v492_v51 = vpop.f32.mrf.mxu2 }
 0x9d6   :  { %v546_v53 = vpop.f32.mrf.mxu0 }
 0x9d7   :  { %v550_v54 = vadd.f32 %v546_v53, %v100_v52 }
 0x9d9   :  { %v551_v55 = vmul.f32 %v550_v54, %v1214_v11 }
 0x9db   :  { %1118 = vtanh.f32 %v551_v55 }
 0x9dc   :  { %v494_v56 = vpop.f32.mrf.mxu2  ;;  %v511_v57 = vpop.f32.mrf.mxu3 }
 0x9dd   :  { %v512_v58 = vadd.f32 %v511_v57, %v492_v51 }
 0x9de   :  { %v548_v59 = vpop.f32.mrf.mxu0 }
 0x9df   :  { %v515_v60 = vadd.f32 %v1269_v38, %v512_v58 }
 0x9e1   :  { %v1119_v61 = vpop.eup %1118  ;;  %v516_v62 = vmul.f32 %v515_v60, %v1214_v11 }
 0x9e2   :  { %v553_v63 = vmul.f32 %v1119_v61, %v1214_v11 }
 0x9e3   :  { %1120 = vtanh.f32 %v516_v62 }
 0x9e4   :  { %v513_v0 = vpop.f32.mrf.mxu3  ;;  %v554_v2 = vadd.f32 %v553_v63, %v1217_v17 }
 0x9e6   :  { %557 = vrot.lane.b32.xlu1 %v554_v2, %s1160_s22  ;;  %v555_v18 = vmul.f32 %v554_v2, %v1341_v30 }
 0x9e9   :  { %v1121_v4 = vpop.eup %1120 }
 0x9ea   :  { %v518_v5 = vmul.f32 %v1121_v4, %v1214_v11 }
 0x9ec   :  { %v519_v6 = vadd.f32 %v518_v5, %v1217_v17 }
 0x9ee   :  { %522 = vrot.lane.b32.xlu2 %v519_v6, %s1160_s22  ;;  %v520_v13 = vmul.f32 %v519_v6, %v433_v34 }
 0xa48   :  { %v523_v8 = vpop.permute.xlu2 %522 }
 0xa49   :  { %v525_v9 = vmul.f32 %v523_v8, %v519_v6 }
 0xa4b   :  { %527 = vrot.lane.b32.xlu1 %v525_v9, %s1161_s23 }
 0xa58   :  { %v558_v10 = vpop.permute.xlu1 %557 }
 0xa59   :  { %v560_v12 = vmul.f32 %v558_v10, %v554_v2 }
 0xa5b   :  { %562 = vrot.lane.b32.xlu0 %v560_v12, %s1161_s23  ;;  %v105_v12 = vadd.f32 %v1211_v7, %v1368_v49 }
 0xabd   :  { %v528_v14 = vpop.permute.xlu1 %527 }
 0xabe   :  { %v530_v15 = vadd.f32 %v528_v14, %v520_v13 }
 0xac0   :  { %1122 = vtanh.f32 %v530_v15 }
 0xac6   :  { %v1123_v16 = vpop.eup %1122 }
 0xac7   :  { %533 = vrot.lane.b32.xlu0 %v1123_v16, %s1160_s22 }
 0xacd   :  { %v563_v19 = vpop.permute.xlu0 %562 }
 0xace   :  { %v565_v20 = vadd.f32 %v563_v19, %v555_v18 }
 0xad0   :  { %1124 = vtanh.f32 %v565_v20 }
 0xad6   :  { %v1125_v21 = vpop.eup %1124 }
 0xad7   :  { %568 = vrot.lane.b32.xlu2 %v1125_v21, %s1160_s22 }
 0xb31   :  { %v569_v22 = vpop.permute.xlu2 %568 }
 0xb32   :  { %v571_v23 = vmul.f32 %v569_v22, %v554_v2 }
 0xb34   :  { %v572_v24 = vpack.c.bf16 %v571_v23, %v571_v23 }
 0xb36   :  { %594 = vrot.lane.b32.xlu1 %v572_v24, %s1161_s23 }
 0xb39   :  { %v534_v25 = vpop.permute.xlu0 %533 }
 0xb3a   :  { %v536_v31 = vmul.f32 %v534_v25, %v519_v6 }
 0xb3c   :  { %v573_v32 = vpack.c.bf16 %v536_v31, %v536_v31 }
 0xb3e   :  { %575 = vrot.lane.b32.xlu2 %v573_v32, %s1161_s23 }
 0xb98   :  { %v576_v33 = vpop.permute.xlu2 %575 }
 0xb99   :  { %1059 = vmatmul.msk.bf16.vlgmr.msra.gmra.mxu1 %vm128_vm4, %v576_v33 }
 0xb9a   :  { %834 = vmatpush.bf16.msra.mxu1 %v1189_v1  ;;  %v102_v1 = vadd.f32 %v1211_v7, %v1366_v48 }
 0xb9e   :  { %835 = vmatpush.bf16.msra.mxu1 %v1198_v3 }
 0xba8   :  { %v595_v30 = vpop.permute.xlu1 %594 }
 0xba9   :  { %1060 = vmatmul.msk.bf16.vlgmr.msra.gmra.mxu2 %vm128_vm4, %v595_v30  ;;  %1061 = vmatmul.msk.bf16.vlgmr.msra.gmra.mxu3 %vm128_vm4, %v595_v30 }
 0xbaa   :  { %896 = vmatpush.bf16.msra.mxu3 %v1235_v27  ;;  %877 = vmatpush.bf16.msra.mxu2 %v1230_v26 }
 0xbae   :  { %897 = vmatpush.bf16.msra.mxu3 %v1247_v29  ;;  %878 = vmatpush.bf16.msra.mxu2 %v1241_v28 }
 0xc16   :  { %v589_v34 = vpop.f32.mrf.mxu1 }
 0xc1e   :  { %v591_v35 = vpop.f32.mrf.mxu1 }
 0xc2c   :  { %v608_v36 = vpop.f32.mrf.mxu2  ;;  %v643_v3 = vpop.f32.mrf.mxu3 }
 0xc2d   :  { %v609_v37 = vadd.f32 %v608_v36, %v589_v34  ;;  %v647_v39 = vadd.f32 %v643_v3, %v102_v1 }
 0xc2f   :  { %v612_v40 = vadd.f32 %v1269_v38, %v609_v37  ;;  %v648_v41 = vmul.f32 %v647_v39, %v1214_v11 }
 0xc31   :  { %v613_v27 = vmul.f32 %v612_v40, %v1214_v11  ;;  %1126 = vtanh.f32 %v648_v41 }
 0xc33   :  { %1128 = vtanh.f32 %v613_v27 }
 0xc34   :  { %v610_v26 = vpop.f32.mrf.mxu2  ;;  %v645_v29 = vpop.f32.mrf.mxu3 }
 0xc37   :  { %v1127_v28 = vpop.eup %1126 }
 0xc38   :  { %v650_v42 = vmul.f32 %v1127_v28, %v1214_v11 }
 0xc39   :  { %v1129_v43 = vpop.eup %1128 }
 0xc3a   :  { %v651_v44 = vadd.f32 %v650_v42, %v1217_v17  ;;  %v615_v45 = vmul.f32 %v1129_v43, %v1214_v11 }
 0xc3c   :  { %654 = vrot.lane.b32.xlu1 %v651_v44, %s1160_s22  ;;  %v616_v46 = vadd.f32 %v615_v45, %v1217_v17  ;;  %v652_v57 = vmul.f32 %v651_v44, %v565_v20 }
 0xc3e   :  { %619 = vrot.lane.b32.xlu0 %v616_v46, %s1160_s22  ;;  %v617_v53 = vmul.f32 %v616_v46, %v530_v15 }
 0xcae   :  { %v655_v47 = vpop.permute.xlu1 %654 }
 0xcaf   :  { %v657_v48 = vmul.f32 %v655_v47, %v651_v44 }
 0xcb0   :  { %v620_v51 = vpop.permute.xlu0 %619 }
 0xcb1   :  { %v622_v52 = vmul.f32 %v620_v51, %v616_v46  ;;  %659 = vrot.lane.b32.xlu0 %v657_v48, %s1161_s23  ;;  %v107_v48 = vadd.f32 %v1211_v7, %v1370_v50 }
 0xcb3   :  { %624 = vrot.lane.b32.xlu2 %v622_v52, %s1161_s23 }
 0xd0d   :  { %v625_v54 = vpop.permute.xlu2 %624 }
 0xd0e   :  { %v627_v55 = vadd.f32 %v625_v54, %v617_v53 }
 0xd10   :  { %1130 = vtanh.f32 %v627_v55 }
 0xd16   :  { %v1131_v56 = vpop.eup %1130 }
 0xd17   :  { %630 = vrot.lane.b32.xlu1 %v1131_v56, %s1160_s22 }
 0xd23   :  { %v660_v58 = vpop.permute.xlu0 %659 }
 0xd24   :  { %v662_v59 = vadd.f32 %v660_v58, %v652_v57 }
 0xd26   :  { %1132 = vtanh.f32 %v662_v59 }
 0xd2c   :  { %v1133_v60 = vpop.eup %1132 }
 0xd2d   :  { %665 = vrot.lane.b32.xlu2 %v1133_v60, %s1160_s22 }
 0xd87   :  { %v666_v61 = vpop.permute.xlu2 %665 }
 0xd88   :  { %v668_v62 = vmul.f32 %v666_v61, %v651_v44 }
 0xd89   :  { %v631_v63 = vpop.permute.xlu1 %630 }
 0xd8a   :  { %v669_v0 = vpack.c.bf16 %v668_v62, %v668_v62  ;;  %v633_v2 = vmul.f32 %v631_v63, %v616_v46 }
 0xd8c   :  { %v670_v4 = vpack.c.bf16 %v633_v2, %v633_v2  ;;  %691 = vrot.lane.b32.xlu1 %v669_v0, %s1161_s23 }
 0xd8e   :  { %672 = vrot.lane.b32.xlu0 %v670_v4, %s1161_s23 }
 0xdfe   :  { %v692_v5 = vpop.permute.xlu1 %691 }
 0xdff   :  { %1063 = vmatmul.msk.bf16.vlgmr.msrb.gmra.mxu1 %vm128_vm4, %v692_v5  ;;  %1064 = vmatmul.msk.bf16.vlgmr.msrb.gmra.mxu2 %vm128_vm4, %v692_v5 }
 0xe00   :  { %v673_v6 = vpop.permute.xlu0 %672 }
 0xe01   :  { %1062 = vmatmul.msk.bf16.vlgmr.msra.gmra.mxu0 %vm128_vm4, %v673_v6 }
 0xe7c   :  { %v705_v8 = vpop.f32.mrf.mxu1 }
 0xe7e   :  { %v686_v9 = vpop.f32.mrf.mxu0 }
 0xe7f   :  { %v706_v10 = vadd.f32 %v705_v8, %v686_v9 }
 0xe81   :  { %v709_v13 = vadd.f32 %v1269_v38, %v706_v10 }
 0xe82   :  { %v740_v14 = vpop.f32.mrf.mxu2 }
 0xe83   :  { %v710_v15 = vmul.f32 %v709_v13, %v1214_v11  ;;  %v744_v16 = vadd.f32 %v740_v14, %v105_v12 }
 0xe84   :  { %v707_v18 = vpop.f32.mrf.mxu1 }
 0xe85   :  { %1134 = vtanh.f32 %v710_v15  ;;  %v745_v19 = vmul.f32 %v744_v16, %v1214_v11 }
 0xe86   :  { %v688_v20 = vpop.f32.mrf.mxu0 }
 0xe87   :  { %1136 = vtanh.f32 %v745_v19 }
 0xe8a   :  { %v742_v21 = vpop.f32.mrf.mxu2 }
 0xe8b   :  { %v1135_v22 = vpop.eup %1134 }
 0xe8c   :  { %v712_v23 = vmul.f32 %v1135_v22, %v1214_v11 }
 0xe8d   :  { %v1137_v24 = vpop.eup %1136 }
 0xe8e   :  { %v713_v25 = vadd.f32 %v712_v23, %v1217_v17  ;;  %v747_v49 = vmul.f32 %v1137_v24, %v1214_v11 }
 0xe90   :  { %716 = vrot.lane.b32.xlu2 %v713_v25, %s1160_s22  ;;  %v748_v31 = vadd.f32 %v747_v49, %v1217_v17  ;;  %v714_v35 = vmul.f32 %v713_v25, %v627_v55 }
 0xe92   :  { %751 = vrot.lane.b32.xlu0 %v748_v31, %s1160_s22  ;;  %v749_v3 = vmul.f32 %v748_v31, %v662_v59 }
 0xeea   :  { %v717_v32 = vpop.permute.xlu2 %716 }
 0xeeb   :  { %v719_v33 = vmul.f32 %v717_v32, %v713_v25 }
 0xeed   :  { %721 = vrot.lane.b32.xlu1 %v719_v33, %s1161_s23 }
 0xf04   :  { %v752_v30 = vpop.permute.xlu0 %751 }
 0xf05   :  { %v754_v34 = vmul.f32 %v752_v30, %v748_v31 }
 0xf07   :  { %756 = vrot.lane.b32.xlu2 %v754_v34, %s1161_s23 }
 0xf5f   :  { %v722_v1 = vpop.permute.xlu1 %721 }
 0xf60   :  { %v724_v36 = vadd.f32 %v722_v1, %v714_v35 }
 0xf61   :  { %v757_v37 = vpop.permute.xlu2 %756 }
 0xf62   :  { %1138 = vtanh.f32 %v724_v36  ;;  %v759_v39 = vadd.f32 %v757_v37, %v749_v3 }
 0xf64   :  { %1140 = vtanh.f32 %v759_v39 }
 0xf68   :  { %v1139_v40 = vpop.eup %1138 }
 0xf69   :  { %727 = vrot.lane.b32.xlu0 %v1139_v40, %s1160_s22 }
 0xf6a   :  { %v1141_v41 = vpop.eup %1140 }
 0xf6b   :  { %762 = vrot.lane.b32.xlu1 %v1141_v41, %s1160_s22 }
 0xfdb   :  { %v728_v27 = vpop.permute.xlu0 %727 }
 0xfdc   :  { %v730_v26 = vmul.f32 %v728_v27, %v713_v25 }
 0xfdd   :  { %v763_v29 = vpop.permute.xlu1 %762 }
 0xfde   :  { %v767_v28 = vpack.c.bf16 %v730_v26, %v730_v26  ;;  %v765_v42 = vmul.f32 %v763_v29, %v748_v31 }
 0xfe0   :  { %v766_v43 = vpack.c.bf16 %v765_v42, %v765_v42  ;;  %769 = vrot.lane.b32.xlu2 %v767_v28, %s1161_s23 }
 0xfe2   :  { %788 = vrot.lane.b32.xlu0 %v766_v43, %s1161_s23  ;;  %v1162_v43 = vmov 32.0  }
0x103a   :  { %v770_v44 = vpop.permute.xlu2 %769 }
0x103b   :  { %1065 = vmatmul.msk.bf16.vlgmr.msrb.gmra.mxu3 %vm128_vm4, %v770_v44 }
0x1054   :  { %v789_v45 = vpop.permute.xlu0 %788 }
0x1055   :  { %1066 = vmatmul.msk.bf16.vlgmr.msrb.gmra.mxu0 %vm128_vm4, %v789_v45  ;;  %1067 = vmatmul.msk.bf16.vlgmr.msra.gmra.mxu1 %vm128_vm4, %v789_v45 }
0x10be   :  { %v783_v46 = vpop.f32.mrf.mxu3 }
0x10c6   :  { %v785_v47 = vpop.f32.mrf.mxu3 }
0x10d2   :  { %v802_v51 = vpop.f32.mrf.mxu0  ;;  %v837_v52 = vpop.f32.mrf.mxu1 }
0x10d3   :  { %v803_v53 = vadd.f32 %v802_v51, %v783_v46  ;;  %v841_v54 = vadd.f32 %v837_v52, %v107_v48  ;;  %v967_v51 = vld [vmem:[%s1490_s2 + $0x28] sm:$0xff]  ;;  %v966_v52 = vld [vmem:[%s1490_s2 + $0x20] sm:$0xff] }
0x10d4   :  { %987 = vmatpush.msra.mxu0 %v967_v51 }
0x10d5   :  { %v806_v55 = vadd.f32 %v1269_v38, %v803_v53  ;;  %v842_v56 = vmul.f32 %v841_v54, %v1214_v11  ;;  %v965_v54 = vld [vmem:[%s1490_s2 + $0x18] sm:$0xff] }
0x10d6   :  { %988 = vmatpush.msra.mxu0 %v966_v52 }
0x10d7   :  { %v807_v57 = vmul.f32 %v806_v55, %v1214_v11  ;;  %1142 = vtanh.f32 %v842_v56 }
0x10d8   :  { %989 = vmatpush.msra.mxu0 %v965_v54 }
0x10d9   :  { %1144 = vtanh.f32 %v807_v57  ;;  %v964_v57 = vld [vmem:[%s1490_s2 + $0x10] sm:$0xff] }
0x10da   :  { %v804_v58 = vpop.f32.mrf.mxu0  ;;  %v839_v59 = vpop.f32.mrf.mxu1  ;;  %990 = vmatpush.msra.mxu0 %v964_v57 }
0x10dd   :  { %v1143_v60 = vpop.eup %1142 }
0x10de   :  { %v844_v61 = vmul.f32 %v1143_v60, %v1214_v11 }
0x10df   :  { %v1145_v62 = vpop.eup %1144 }
0x10e0   :  { %v845_v7 = vadd.f32 %v844_v61, %v1217_v17  ;;  %v809_v50 = vmul.f32 %v1145_v62, %v1214_v11 }
0x10e2   :  { %848 = vrot.lane.b32.xlu2 %v845_v7, %s1160_s22  ;;  %v810_v63 = vadd.f32 %v809_v50, %v1217_v17  ;;  %v846_v6 = vmul.f32 %v845_v7, %v759_v39 }
0x10e4   :  { %813 = vrot.lane.b32.xlu1 %v810_v63, %s1160_s22  ;;  %v811_v12 = vmul.f32 %v810_v63, %v724_v36 }
0x113c   :  { %v849_v0 = vpop.permute.xlu2 %848 }
0x113d   :  { %v851_v2 = vmul.f32 %v849_v0, %v845_v7 }
0x113f   :  { %853 = vrot.lane.b32.xlu1 %v851_v2, %s1161_s23 }
0x1156   :  { %v814_v4 = vpop.permute.xlu1 %813 }
0x1157   :  { %v816_v5 = vmul.f32 %v814_v4, %v810_v63 }
0x1159   :  { %818 = vrot.lane.b32.xlu0 %v816_v5, %s1161_s23 }
0x11b1   :  { %v854_v8 = vpop.permute.xlu1 %853 }
0x11b2   :  { %v856_v9 = vadd.f32 %v854_v8, %v846_v6 }
0x11b4   :  { %1146 = vtanh.f32 %v856_v9 }
0x11ba   :  { %v1147_v10 = vpop.eup %1146 }
0x11bb   :  { %859 = vrot.lane.b32.xlu0 %v1147_v10, %s1160_s22  ;;  %v1089_v10 = vld [vmem:[%s1490_s2 + $0x30] ss:$0 sm:$0xff] }
0x11cb   :  { %v819_v13 = vpop.permute.xlu0 %818 }
0x11cc   :  { %v821_v14 = vadd.f32 %v819_v13, %v811_v12 }
0x11ce   :  { %1148 = vtanh.f32 %v821_v14 }
0x11d4   :  { %v1149_v15 = vpop.eup %1148 }
0x11d5   :  { %824 = vrot.lane.b32.xlu2 %v1149_v15, %s1160_s22 }
0x122d   :  { %v860_v16 = vpop.permute.xlu0 %859 }
0x122e   :  { %v862_v18 = vmul.f32 %v860_v16, %v845_v7 }
0x122f   :  { %v825_v19 = vpop.permute.xlu2 %824 }
0x1230   :  { %v863_v20 = vpack.c.bf16 %v862_v18, %v862_v18  ;;  %v827_v21 = vmul.f32 %v825_v19, %v810_v63 }
0x1232   :  { %v864_v22 = vpack.c.bf16 %v827_v21, %v827_v21  ;;  %885 = vrot.lane.b32.xlu2 %v863_v20, %s1161_s23 }
0x1234   :  { %866 = vrot.lane.b32.xlu1 %v864_v22, %s1161_s23 }
0x128c   :  { %v886_v23 = vpop.permute.xlu2 %885 }
0x128d   :  { %1069 = vmatmul.msk.bf16.vlgmr.msra.gmra.mxu3 %vm128_vm4, %v886_v23 }
0x12a6   :  { %v867_v24 = vpop.permute.xlu1 %866 }
0x12a7   :  { %1068 = vmatmul.msk.bf16.vlgmr.msra.gmra.mxu2 %vm128_vm4, %v867_v24 }
0x1310   :  { %v899_v25 = vpop.f32.mrf.mxu3 }
0x1318   :  { %v901_v49 = vpop.f32.mrf.mxu3 }
0x132a   :  { %v880_v31 = vpop.f32.mrf.mxu2 }
0x132b   :  { %v900_v32 = vadd.f32 %v899_v25, %v880_v31 }
0x132d   :  { %v903_v33 = vadd.f32 %v1269_v38, %v900_v32 }
0x132f   :  { %v904_v30 = vmul.f32 %v903_v33, %v1214_v11 }
0x1331   :  { %1150 = vtanh.f32 %v904_v30 }
0x1332   :  { %v882_v34 = vpop.f32.mrf.mxu2 }
0x1337   :  { %v1151_v35 = vpop.eup %1150 }
0x1338   :  { %v906_v1 = vmul.f32 %v1151_v35, %v1214_v11 }
0x133a   :  { %v907_v36 = vadd.f32 %v906_v1, %v1217_v17 }
0x133c   :  { %910 = vrot.lane.b32.xlu0 %v907_v36, %s1160_s22  ;;  %v908_v39 = vmul.f32 %v907_v36, %v821_v14 }
0x13ae   :  { %v911_v3 = vpop.permute.xlu0 %910 }
0x13af   :  { %v913_v37 = vmul.f32 %v911_v3, %v907_v36 }
0x13b1   :  { %915 = vrot.lane.b32.xlu1 %v913_v37, %s1161_s23 }
0x1423   :  { %v916_v40 = vpop.permute.xlu1 %915 }
0x1424   :  { %v918_v41 = vadd.f32 %v916_v40, %v908_v39 }
0x1426   :  { %1152 = vtanh.f32 %v918_v41 }
0x1427   :  { %1154 = vrcp.f32 %v1162_v43 }
0x142c   :  { %v1153_v38 = vpop.eup %1152 }
0x142d   :  { %921 = vrot.lane.b32.xlu2 %v1153_v38, %s1160_s22  ;;  %v1155_v44 = vpop.eup %1154 }
0x142e   :  { %v933_v45 = vmul.f32 32.0, %v1155_v44  ;;  %vm937_vm5 = vweird.f32 %v1155_v44 }
0x1430   :  { %v934_v46 = vsub.f32 1.0, %v933_v45 }
0x1432   :  { %v935_v47 = vmul.f32 %v1155_v44, %v934_v46 }
0x1434   :  { %v936_v48 = vadd.f32 %v1155_v44, %v935_v47 }
0x1436   :  { %v938_v53 = vsel %vm937_vm5, %v1155_v44, %v936_v48 }
0x1487   :  { %v922_v27 = vpop.permute.xlu2 %921 }
0x1488   :  { %v924_v26 = vmul.f32 %v922_v27, %v907_v36 }
0x148a   :  { %926 = vrot.lane.b32.xlu0 %v924_v26, %s1161_s23  ;;  %v940_v11 = vmul.f32 %v924_v26, %v924_v26 }
0x148c   :  { %942 = vrot.lane.b32.xlu1 %v940_v11, %s1161_s23 }
0x14fc   :  { %v927_v17 = vpop.permute.xlu0 %926 }
0x14fd   :  { %v929_v29 = vsel %vm128_vm4, %v927_v17, 0.0 }
0x14fe   :  { %930 = vadd.xlane.f32.xlu2 %v929_v29  ;;  %v943_v28 = vpop.permute.xlu1 %942 }
0x14ff   :  { %v945_v42 = vsel %vm128_vm4, %v943_v28, 0.0 }
0x1500   :  { %946 = vadd.xlane.f32.xlu0 %v945_v42 }
0x1571   :  { %v931_v55 = vpop.xlane.xlu2 %930 }
0x1572   :  { %v939_v56 = vmul.f32 %v938_v53, %v931_v55 }
0x1573   :  { %v947_v58 = vpop.xlane.xlu0 %946 }
0x1574   :  { %v949_v59 = vmul.f32 %v939_v56, %v939_v56  ;;  %v948_v60 = vmul.f32 %v947_v58, %v938_v53  ;;  %v951_v5 = vsub.f32 %v924_v26, %v939_v56 }
0x1576   :  { %v950_v61 = vsub.f32 %v948_v60, %v949_v59 }
0x1578   :  { %v952_v62 = vadd.f32 1e-05, %v950_v61 }
0x157a   :  { %1156 = vrsqrt.f32 %v952_v62  ;;  %vm959_vm7 = vweird.f32 %v952_v62 }
0x1580   :  { %v1157_v7 = vpop.eup %1156 }
0x1581   :  { %v954_v50 = vmul.f32 %v1157_v7, %v952_v62  ;;  %vm960_vm6 = vweird.f32 %v1157_v7 }
0x1582   :  { %vm961_vm8 = vmor %vm959_vm7, %vm960_vm6 }
0x1583   :  { %v955_v63 = vmul.f32 %v1157_v7, %v954_v50 }
0x1585   :  { %v956_v0 = vmul.f32 0.5, %v955_v63 }
0x1587   :  { %v957_v2 = vsub.f32 1.5, %v956_v0 }
0x1589   :  { %v958_v4 = vmul.f32 %v1157_v7, %v957_v2 }
0x158b   :  { %v962_v6 = vsel %vm961_vm8, %v1157_v7, %v958_v4 }
0x158c   :  { %v963_v8 = vmul.f32 %v962_v6, %v951_v5 }
0x158e   :  { %971 = vrot.lane.b32.xlu1 %v963_v8, %s1161_s23 }
0x1600   :  { %v972_v9 = vpop.permute.xlu1 %971 }
0x1601   :  { %1070 = vmatmul.msk.f32.vlgmr.msra.gmra.mxu0 %vm128_vm4, %v972_v9 }
0x167e   :  { %v992_v12 = vpop.f32.mrf.mxu0 }
0x167f   :  { %v993_v13 = vadd.f32 %v1089_v10, %v992_v12 }
0x1681   :  { %995 = vst [vmem:[%s1491_s3] sm:$0xff] %v993_v13 }

</bundles_post_ra>
